<compile_context>
chip_gen: v7x
topology: tpu7x:2x2x1
jax: 0.10.0
libtpu: 0.0.40
codegen_flags: <defaults>
</compile_context>

<pallas_src>
import functools

import jax
import jax.numpy as jnp
from jax.experimental import pallas as pl
from jax.experimental.pallas import tpu as pltpu


# ------------------------------ helpers -------------------------------------

_VMEM_LIMIT = 32 * 1024 * 1024  # per-kernel scoped VMEM (safe on v5e/v6e/v7x)


def _pick_tile(dim, desired, align):
    """Largest tile <= desired that divides dim and is a multiple of `align`;
    falls back to the full extent (callers check the working-set size)."""
    if dim <= desired:
        return dim
    t = desired
    while t >= align:
        if dim % t == 0:
            return t
        t -= align
    return dim


def _apply_act(x, act):
    if act == "none":
        return x
    if act == "gelu":
        # tanh-approx GELU (safe Mosaic lowering).
        # TODO(synk): HF BERT default is exact erf GELU; ~1e-3 divergence.
        return jax.nn.gelu(x, approximate=True)
    if act == "relu":
        return jnp.maximum(x, 0.0)
    raise ValueError(f"unknown act: {act}")


def _check_vmem(name, est_bytes, limit):
    if est_bytes > limit:
        raise ValueError(
            f"{name}: tile working set ~{est_bytes / 2**20:.1f} MiB exceeds "
            f"per-kernel VMEM limit {limit / 2**20:.1f} MiB; choose smaller tiles "
            f"or pad the problem to tileable sizes.")


def _ln_core(x, g, b, eps):
    mean = jnp.mean(x, axis=-1, keepdims=True)
    var = jnp.mean(jnp.square(x - mean), axis=-1, keepdims=True)  # biased (torch LN)
    inv = jax.lax.rsqrt(var + eps)
    return (x - mean) * inv * g + b


# ---------------- dense: matmul + bias + act (+ residual + LayerNorm) --------

def _dense_kernel(x_ref, w_ref, b_ref, o_ref, *, act):
    y = jnp.dot(x_ref[...], w_ref[...], preferred_element_type=jnp.float32)
    o_ref[...] = _apply_act(y + b_ref[...], act).astype(o_ref.dtype)


def _dense_ln_kernel(x_ref, w_ref, b_ref, r_ref, g_ref, bb_ref, o_ref, *, act, eps):
    y = jnp.dot(x_ref[...], w_ref[...], preferred_element_type=jnp.float32)
    y = _apply_act(y + b_ref[...], act) + r_ref[...].astype(jnp.float32)
    o_ref[...] = _ln_core(y, g_ref[...], bb_ref[...], eps).astype(o_ref.dtype)


def _dense_acc_kernel(x_ref, w_ref, b_ref, o_ref, acc_ref, *, act):
    @pl.when(pl.program_id(2) == 0)
    def _init():
        acc_ref[...] = jnp.zeros_like(acc_ref)

    acc_ref[...] += jnp.dot(x_ref[...], w_ref[...],
                            preferred_element_type=jnp.float32)

    @pl.when(pl.program_id(2) == pl.num_programs(2) - 1)
    def _finalize():
        o_ref[...] = _apply_act(acc_ref[...] + b_ref[...], act).astype(o_ref.dtype)


def _dense_acc_ln_kernel(x_ref, w_ref, b_ref, r_ref, g_ref, bb_ref, o_ref,
                         acc_ref, *, act, eps):
    @pl.when(pl.program_id(2) == 0)
    def _init():
        acc_ref[...] = jnp.zeros_like(acc_ref)

    acc_ref[...] += jnp.dot(x_ref[...], w_ref[...],
                            preferred_element_type=jnp.float32)

    @pl.when(pl.program_id(2) == pl.num_programs(2) - 1)
    def _finalize():
        y = _apply_act(acc_ref[...] + b_ref[...], act) + r_ref[...].astype(jnp.float32)
        o_ref[...] = _ln_core(y, g_ref[...], bb_ref[...], eps).astype(o_ref.dtype)


def dense(x, w, b, act="none", *, residual=None, ln=None, ln_eps=1e-12,
          out_dtype=jnp.bfloat16, tm=512, tn=512, tk=1536,
          vmem_limit=_VMEM_LIMIT):
    """y = act(x @ w + b), optionally followed by LayerNorm(y + residual).

    x:(M,K), w:(K,N), b:(N,). bf16 operands, f32 MXU accumulation.
    When K <= tk the K grid axis / accumulator scratch are dropped entirely.
    When ln=(gamma, beta) is given, tn is forced to N (LN needs full rows) and
    the residual-add + LayerNorm run in the matmul epilogue.
    """
    M, K = x.shape
    Kw, N = w.shape
    assert K == Kw
    x = x.astype(jnp.bfloat16)      # no-op when already bf16
    w = w.astype(jnp.bfloat16)      # no-op: weights are pre-cast at param prep
    b2 = b.reshape(1, N).astype(jnp.float32)

    tm = _pick_tile(M, tm, 8)
    tn = N if ln is not None else _pick_tile(N, tn, 128)
    tk = K if K <= tk else _pick_tile(K, tk, 128)

    # double-buffered bf16 inputs/outputs + f32 accumulator working-set check
    est = 2 * 2 * (tm * tk + tk * tn + tm * tn)
    if tk != K:
        est += 4 * tm * tn
    if residual is not None:
        est += 2 * 2 * tm * tn
    _check_vmem("dense", est, vmem_limit)

    out_shape = jax.ShapeDtypeStruct((M, N), out_dtype)
    cp2 = pltpu.CompilerParams(dimension_semantics=("parallel", "parallel"),
                               vmem_limit_bytes=vmem_limit)
    cp3 = pltpu.CompilerParams(
        dimension_semantics=("parallel", "parallel", "arbitrary"),
        vmem_limit_bytes=vmem_limit)

    if ln is not None:
        assert residual is not None, "fused LayerNorm requires a residual input"
        gamma, beta = ln
        g2 = gamma.reshape(1, N).astype(jnp.float32)
        bb2 = beta.reshape(1, N).astype(jnp.float32)
        r = residual.astype(jnp.bfloat16)
        if tk == K:                 # single K pass: no accumulator, no pl.when
            return pl.pallas_call(
                functools.partial(_dense_ln_kernel, act=act, eps=ln_eps),
                out_shape=out_shape,
                grid=(M // tm, N // tn),
                in_specs=[
                    pl.BlockSpec((tm, K), lambda i, j: (i, 0)),
                    pl.BlockSpec((K, tn), lambda i, j: (0, j)),
                    pl.BlockSpec((1, tn), lambda i, j: (0, j)),
                    pl.BlockSpec((tm, tn), lambda i, j: (i, j)),
                    pl.BlockSpec((1, tn), lambda i, j: (0, j)),
                    pl.BlockSpec((1, tn), lambda i, j: (0, j)),
                ],
                out_specs=pl.BlockSpec((tm, tn), lambda i, j: (i, j)),
                compiler_params=cp2,
            )(x, w, b2, r, g2, bb2)
        return pl.pallas_call(
            functools.partial(_dense_acc_ln_kernel, act=act, eps=ln_eps),
            out_shape=out_shape,
            grid=(M // tm, N // tn, K // tk),
            in_specs=[
                pl.BlockSpec((tm, tk), lambda i, j, k: (i, k)),
                pl.BlockSpec((tk, tn), lambda i, j, k: (k, j)),
                pl.BlockSpec((1, tn), lambda i, j, k: (0, j)),
                pl.BlockSpec((tm, tn), lambda i, j, k: (i, j)),
                pl.BlockSpec((1, tn), lambda i, j, k: (0, j)),
                pl.BlockSpec((1, tn), lambda i, j, k: (0, j)),
            ],
            out_specs=pl.BlockSpec((tm, tn), lambda i, j, k: (i, j)),
            scratch_shapes=[pltpu.VMEM((tm, tn), jnp.float32)],
            compiler_params=cp3,
        )(x, w, b2, r, g2, bb2)

    if tk == K:                     # single K pass: no accumulator, no pl.when
        return pl.pallas_call(
            functools.partial(_dense_kernel, act=act),
            out_shape=out_shape,
            grid=(M // tm, N // tn),
            in_specs=[
                pl.BlockSpec((tm, K), lambda i, j: (i, 0)),
                pl.BlockSpec((K, tn), lambda i, j: (0, j)),
                pl.BlockSpec((1, tn), lambda i, j: (0, j)),
            ],
            out_specs=pl.BlockSpec((tm, tn), lambda i, j: (i, j)),
            compiler_params=cp2,
        )(x, w, b2)
    return pl.pallas_call(
        functools.partial(_dense_acc_kernel, act=act),
        out_shape=out_shape,
        grid=(M // tm, N // tn, K // tk),
        in_specs=[
            pl.BlockSpec((tm, tk), lambda i, j, k: (i, k)),
            pl.BlockSpec((tk, tn), lambda i, j, k: (k, j)),
            pl.BlockSpec((1, tn), lambda i, j, k: (0, j)),
        ],
        out_specs=pl.BlockSpec((tm, tn), lambda i, j, k: (i, j)),
        scratch_shapes=[pltpu.VMEM((tm, tn), jnp.float32)],
        compiler_params=cp3,
    )(x, w, b2)


# ---------------------- standalone LayerNorm (embeddings) --------------------

def _ln_kernel(x_ref, g_ref, b_ref, o_ref, *, eps):
    x = x_ref[...].astype(jnp.float32)
    o_ref[...] = _ln_core(x, g_ref[...], b_ref[...], eps).astype(o_ref.dtype)


def layernorm(x, gamma, beta, *, eps=1e-12, out_dtype=jnp.bfloat16, tm=1024,
              vmem_limit=_VMEM_LIMIT):
    """LayerNorm(x) over the last dim; row-tiled + pipelined (bf16 in/out)."""
    M, H = x.shape
    tm = _pick_tile(M, tm, 8)
    _check_vmem("layernorm", 2 * 2 * 2 * tm * H, vmem_limit)
    g2 = gamma.reshape(1, H).astype(jnp.float32)
    b2 = beta.reshape(1, H).astype(jnp.float32)
    row_spec = pl.BlockSpec((tm, H), lambda i: (i, 0))
    vec_spec = pl.BlockSpec((1, H), lambda i: (0, 0))
    return pl.pallas_call(
        functools.partial(_ln_kernel, eps=eps),
        out_shape=jax.ShapeDtypeStruct((M, H), out_dtype),
        grid=(M // tm,),
        in_specs=[row_spec, vec_spec, vec_spec],
        out_specs=row_spec,
        compiler_params=pltpu.CompilerParams(
            dimension_semantics=("parallel",), vmem_limit_bytes=vmem_limit),
    )(x.astype(jnp.bfloat16), g2, b2)


# -------------------- multi-head attention (head groups, q tiles) ------------

def _attn_kernel(q_ref, k_ref, v_ref, m_ref, o_ref, *, scale):
    q = q_ref[0] * scale               # (G, tq, dH) bf16 — scale q, not scores
    k = k_ref[0]                       # (G, S, dH) bf16
    v = v_ref[0]                       # (G, S, dH) bf16
    mask = m_ref[0]                    # (1, S) f32 additive key mask
    s = jnp.einsum("gqd,gkd->gqk", q, k, preferred_element_type=jnp.float32)
    s = s + mask[:, None, :]
    s = s - jnp.max(s, axis=-1, keepdims=True)
    p = jnp.exp(s)
    p = p * pl.reciprocal(jnp.sum(p, axis=-1, keepdims=True), approx=True)
    ctx = jnp.einsum("gqk,gkd->gqd", p.astype(v.dtype), v,
                     preferred_element_type=jnp.float32)
    o_ref[0] = ctx.astype(o_ref.dtype)


def attention(q, k, v, addmask, *, tq=256, vmem_limit=_VMEM_LIMIT):
    """q,k,v: (B, nH, S, dH) bf16; addmask: (B, 1, S) f32 -> (B, nH, S, dH) bf16."""
    B, nH, S, dH = q.shape
    scale = 1.0 / float(dH) ** 0.5
    G = 1
    for g in (8, 4, 2, 1):             # several heads per grid step
        if nH % g == 0:
            G = g
            break
    tq = _pick_tile(S, tq, 8)          # query tiling keeps softmax scratch small
    est = (2 * 2 * G * dH * (tq + 2 * S + tq)      # q/k/v/out bf16, double-buffered
           + 2 * 4 * G * tq * S)                   # scores + probs f32
    _check_vmem("attention", est, vmem_limit)
    q_spec = pl.BlockSpec((1, G, tq, dH), lambda b, h, qi: (b, h, qi, 0))
    kv_spec = pl.BlockSpec((1, G, S, dH), lambda b, h, qi: (b, h, 0, 0))
    # TODO(synk): for very long S, tile the KV axis flash-style (online softmax).
    return pl.pallas_call(
        functools.partial(_attn_kernel, scale=scale),
        out_shape=jax.ShapeDtypeStruct((B, nH, S, dH), jnp.bfloat16),
        grid=(B, nH // G, S // tq),
        in_specs=[q_spec, kv_spec, kv_spec,
                  pl.BlockSpec((1, 1, S), lambda b, h, qi: (b, 0, 0))],
        out_specs=q_spec,
        compiler_params=pltpu.CompilerParams(
            dimension_semantics=("parallel", "parallel", "parallel"),
            vmem_limit_bytes=vmem_limit),
    )(q, k, v, addmask)


# ----------------------- fused classifier head kernel ------------------------

def _mlp_head_kernel(x_ref, w1_ref, b1_ref, w2_ref, b2_ref, o_ref):
    h = jnp.dot(x_ref[...], w1_ref[...], preferred_element_type=jnp.float32)
    h = jnp.maximum(h + b1_ref[...], 0.0)
    # TODO(synk): nn.Dropout(0.3) is identity in eval/inference mode; omitted.
    z = jnp.dot(h.astype(w2_ref.dtype), w2_ref[...],
                preferred_element_type=jnp.float32)
    o_ref[...] = jax.nn.sigmoid(z + b2_ref[...])


def mlp_head(cls_tok, w1, b1, w2, b2):
    """sigmoid(fc2(relu(fc1(cls)))) fused in one tiny single-block kernel."""
    B, H = cls_tok.shape
    Hm = w1.shape[1]
    No = w2.shape[1]
    return pl.pallas_call(
        _mlp_head_kernel,
        out_shape=jax.ShapeDtypeStruct((B, No), jnp.float32),
        grid=(1,),
        in_specs=[
            pl.BlockSpec((B, H), lambda i: (0, 0)),
            pl.BlockSpec((H, Hm), lambda i: (0, 0)),
            pl.BlockSpec((1, Hm), lambda i: (0, 0)),
            pl.BlockSpec((Hm, No), lambda i: (0, 0)),
            pl.BlockSpec((1, No), lambda i: (0, 0)),
        ],
        out_specs=pl.BlockSpec((B, No), lambda i: (0, 0)),
    )(cls_tok.astype(jnp.bfloat16), w1.astype(jnp.bfloat16),
      b1.reshape(1, Hm).astype(jnp.float32),
      w2.astype(jnp.bfloat16), b2.reshape(1, No).astype(jnp.float32))


# ------------------------- parameters (synthetic) ----------------------------

def init_params(key, *, vocab, max_pos, hidden, num_heads, intermediate,
                num_layers, mlp_hidden):
    def nrm(k, shape):
        return 0.02 * jax.random.normal(k, shape, jnp.float32)

    keys = iter(jax.random.split(key, 16 + 12 * num_layers))
    p = {
        "word_emb": nrm(next(keys), (vocab, hidden)),
        "pos_emb": nrm(next(keys), (max_pos, hidden)),
        "type_emb": nrm(next(keys), (2, hidden)),
        "emb_ln_g": jnp.ones((hidden,), jnp.float32),
        "emb_ln_b": jnp.zeros((hidden,), jnp.float32),
        "layers": [],
    }
    for _ in range(num_layers):
        layer = {
            "wq": nrm(next(keys), (hidden, hidden)), "bq": jnp.zeros((hidden,), jnp.float32),
            "wk": nrm(next(keys), (hidden, hidden)), "bk": jnp.zeros((hidden,), jnp.float32),
            "wv": nrm(next(keys), (hidden, hidden)), "bv": jnp.zeros((hidden,), jnp.float32),
            "wo": nrm(next(keys), (hidden, hidden)), "bo": jnp.zeros((hidden,), jnp.float32),
            "ln1_g": jnp.ones((hidden,), jnp.float32), "ln1_b": jnp.zeros((hidden,), jnp.float32),
            "w1": nrm(next(keys), (hidden, intermediate)), "b1": jnp.zeros((intermediate,), jnp.float32),
            "w2": nrm(next(keys), (intermediate, hidden)), "b2": jnp.zeros((hidden,), jnp.float32),
            "ln2_g": jnp.ones((hidden,), jnp.float32), "ln2_b": jnp.zeros((hidden,), jnp.float32),
        }
        p["layers"].append(layer)
    p["fc1_w"] = nrm(next(keys), (hidden, mlp_hidden))
    p["fc1_b"] = jnp.zeros((mlp_hidden,), jnp.float32)
    p["fc2_w"] = nrm(next(keys), (mlp_hidden, 1))
    p["fc2_b"] = jnp.zeros((1,), jnp.float32)
    return p


def prepare_params(p):
    """One-time inference prep (run OUTSIDE jit): fuse QKV weights/biases and
    pre-cast all matmul weights + embedding tables to bf16 (halves weight HBM
    reads, removes per-forward concat/cast ops); LN params & biases stay f32."""
    bf = lambda a: a.astype(jnp.bfloat16)
    f32 = lambda a: a.astype(jnp.float32)
    out = {
        "word_emb": bf(p["word_emb"]),
        "pos_emb": bf(p["pos_emb"]),
        "type_emb": bf(p["type_emb"]),
        "emb_ln_g": f32(p["emb_ln_g"]), "emb_ln_b": f32(p["emb_ln_b"]),
        "fc1_w": bf(p["fc1_w"]), "fc1_b": f32(p["fc1_b"]),
        "fc2_w": bf(p["fc2_w"]), "fc2_b": f32(p["fc2_b"]),
        "layers": [],
    }
    for l in p["layers"]:
        out["layers"].append({
            "wqkv": bf(jnp.concatenate([l["wq"], l["wk"], l["wv"]], axis=1)),
            "bqkv": f32(jnp.concatenate([l["bq"], l["bk"], l["bv"]], axis=0)),
            "wo": bf(l["wo"]), "bo": f32(l["bo"]),
            "ln1_g": f32(l["ln1_g"]), "ln1_b": f32(l["ln1_b"]),
            "w1": bf(l["w1"]), "b1": f32(l["b1"]),
            "w2": bf(l["w2"]), "b2": f32(l["b2"]),
            "ln2_g": f32(l["ln2_g"]), "ln2_b": f32(l["ln2_b"]),
        })
    return out


# ------------------------------ forward pass ---------------------------------

def bert_mlp_classifier(params, input_ids, attention_mask, *, num_heads):
    """Expects `params` already processed by prepare_params()."""
    B, S = input_ids.shape
    H = params["word_emb"].shape[1]
    dH = H // num_heads

    # embeddings (gather glue stays in JAX, bf16); token_type = 0 everywhere.
    emb = (params["word_emb"][input_ids]
           + params["pos_emb"][:S][None, :, :]
           + params["type_emb"][0][None, None, :])
    x = layernorm(emb.reshape(B * S, H), params["emb_ln_g"], params["emb_ln_b"])

    # HF-style extended additive key mask
    addmask = ((1.0 - attention_mask.astype(jnp.float32)) * -1e9).reshape(B, 1, S)

    def to_heads(t):                    # (M, H) bf16 -> (B, nH, S, dH) bf16
        return t.reshape(B, S, num_heads, dH).transpose(0, 2, 1, 3)

    for layer in params["layers"]:
        # fused QKV projection (weights pre-fused at prep time)
        qkv = dense(x, layer["wqkv"], layer["bqkv"])            # (M, 3H) bf16
        q, k, v = jnp.split(qkv, 3, axis=1)
        # TODO(synk): head split/merge transposes could be folded into the
        #             attention BlockSpecs (lane-dense (B,S,H) writeback).
        ctx = attention(to_heads(q), to_heads(k), to_heads(v), addmask)
        ctx = ctx.transpose(0, 2, 1, 3).reshape(B * S, H)       # bf16 glue

        # attention out-proj with fused residual-add + LayerNorm epilogue
        x = dense(ctx, layer["wo"], layer["bo"],
                  residual=x, ln=(layer["ln1_g"], layer["ln1_b"]))

        # FFN: up-proj + GELU fused; down-proj with fused residual + LayerNorm
        h = dense(x, layer["w1"], layer["b1"], act="gelu")
        x = dense(h, layer["w2"], layer["b2"],
                  residual=x, ln=(layer["ln2_g"], layer["ln2_b"]))

    cls_output = x.reshape(B, S, H)[:, 0, :]                    # (B, H) bf16
    out = mlp_head(cls_output, params["fc1_w"], params["fc1_b"],
                   params["fc2_w"], params["fc2_b"])
    return out                                                  # (B, 1) f32 in (0,1)


# ----------------------------------- main ------------------------------------

if __name__ == "__main__":
    # small, BERT-like shapes
    B, S = 2, 8
    VOCAB, MAX_POS = 100, 16
    HIDDEN, NUM_HEADS, INTERMEDIATE, NUM_LAYERS = 32, 2, 64, 2
    MLP_HIDDEN = 16

    key = jax.random.PRNGKey(0)
    k_param, k_ids = jax.random.split(key)

    raw_params = init_params(
        k_param, vocab=VOCAB, max_pos=MAX_POS, hidden=HIDDEN,
        num_heads=NUM_HEADS, intermediate=INTERMEDIATE,
        num_layers=NUM_LAYERS, mlp_hidden=MLP_HIDDEN)
    params = prepare_params(raw_params)   # fuse QKV + cast to bf16 once, outside jit

    input_ids = jax.random.randint(k_ids, (B, S), 0, VOCAB, dtype=jnp.int32)
    attention_mask = jnp.ones((B, S), dtype=jnp.int32)
    attention_mask = attention_mask.at[1, 6:].set(0)   # some padding in sample 1

    fwd = jax.jit(functools.partial(bert_mlp_classifier, num_heads=NUM_HEADS))
    probs = fwd(params, input_ids, attention_mask)
    jax.block_until_ready(probs)

    assert probs.shape == (B, 1)
    assert bool(jnp.all((probs > 0.0) & (probs < 1.0)))
    print("KERNEL_OK")
</pallas_src>

<mosaic_0001>
module attributes {stable_mosaic.version = 11 : i64} {
  func.func @_ln_kernel(%arg0: i32, %arg1: memref<16x32xbf16, #tpu.memory_space<vmem>>, %arg2: memref<1x32xf32, #tpu.memory_space<vmem>>, %arg3: memref<1x32xf32, #tpu.memory_space<vmem>>, %arg4: memref<16x32xbf16, #tpu.memory_space<vmem>>) attributes {dimension_semantics = [#tpu.dimension_semantics<parallel>], iteration_bounds = array<i64: 1>, scalar_prefetch = 0 : i64, scratch_operands = 0 : i64, tpu.core_type = #tpu.core_type<tc>, window_params = [{transform_indices = @transform_0, window_bounds = array<i64: 16, 32>}, {pipeline_mode = #tpu.pipeline_mode<synchronous>, transform_indices = @transform_1, window_bounds = array<i64: 1, 32>}, {pipeline_mode = #tpu.pipeline_mode<synchronous>, transform_indices = @transform_2, window_bounds = array<i64: 1, 32>}, {transform_indices = @transform_3, window_bounds = array<i64: 16, 32>}]} {
    %c0 = arith.constant 0 : index
    %c0_0 = arith.constant 0 : index
    %0 = vector.load %arg1[%c0, %c0_0] : memref<16x32xbf16, #tpu.memory_space<vmem>>, vector<16x32xbf16>
    %1 = arith.extf %0 : vector<16x32xbf16> to vector<16x32xf32>
    %c0_1 = arith.constant 0 : index
    %c0_2 = arith.constant 0 : index
    %2 = vector.load %arg2[%c0_1, %c0_2] : memref<1x32xf32, #tpu.memory_space<vmem>>, vector<1x32xf32>
    %c0_3 = arith.constant 0 : index
    %c0_4 = arith.constant 0 : index
    %3 = vector.load %arg3[%c0_3, %c0_4] : memref<1x32xf32, #tpu.memory_space<vmem>>, vector<1x32xf32>
    %cst = arith.constant dense<0.000000e+00> : vector<16xf32>
    %4 = vector.multi_reduction <add>, %1, %cst [1] : vector<16x32xf32> to vector<16xf32>
    %5 = vector.shape_cast %4 : vector<16xf32> to vector<16x1xf32>
    %cst_5 = arith.constant 3.200000e+01 : f32
    %6 = vector.broadcast %cst_5 : f32 to vector<16x1xf32>
    %7 = arith.divf %5, %6 : vector<16x1xf32>
    %8 = vector.broadcast %7 : vector<16x1xf32> to vector<16x32xf32>
    %9 = arith.subf %1, %8 : vector<16x32xf32>
    %10 = arith.mulf %9, %9 : vector<16x32xf32>
    %cst_6 = arith.constant dense<0.000000e+00> : vector<16xf32>
    %11 = vector.multi_reduction <add>, %10, %cst_6 [1] : vector<16x32xf32> to vector<16xf32>
    %12 = vector.shape_cast %11 : vector<16xf32> to vector<16x1xf32>
    %cst_7 = arith.constant 3.200000e+01 : f32
    %13 = vector.broadcast %cst_7 : f32 to vector<16x1xf32>
    %14 = arith.divf %12, %13 : vector<16x1xf32>
    %cst_8 = arith.constant 9.99999996E-13 : f32
    %15 = vector.broadcast %cst_8 : f32 to vector<16x1xf32>
    %16 = arith.addf %14, %15 : vector<16x1xf32>
    %17 = math.rsqrt %16 : vector<16x1xf32>
    %18 = vector.broadcast %7 : vector<16x1xf32> to vector<16x32xf32>
    %19 = arith.subf %1, %18 : vector<16x32xf32>
    %20 = vector.broadcast %17 : vector<16x1xf32> to vector<16x32xf32>
    %21 = arith.mulf %19, %20 : vector<16x32xf32>
    %22 = vector.broadcast %2 : vector<1x32xf32> to vector<16x32xf32>
    %23 = arith.mulf %21, %22 : vector<16x32xf32>
    %24 = vector.broadcast %3 : vector<1x32xf32> to vector<16x32xf32>
    %25 = arith.addf %23, %24 : vector<16x32xf32>
    %26 = arith.truncf %25 : vector<16x32xf32> to vector<16x32xbf16>
    %c0_9 = arith.constant 0 : index
    %c0_10 = arith.constant 0 : index
    %27 = vector.load %arg4[%c0_9, %c0_10] : memref<16x32xbf16, #tpu.memory_space<vmem>>, vector<16x32xbf16>
    tpu.vector_store %arg4[%c0_9, %c0_10], %26 {strides = array<i32>} : memref<16x32xbf16, #tpu.memory_space<vmem>>, vector<16x32xbf16>,
    return
  }
  func.func @transform_0(%arg0: i32) -> (i32, i32) {
    %c0_i32 = arith.constant 0 : i32
    %c0_i32_0 = arith.constant 0 : i32
    return %arg0, %c0_i32 : i32, i32
  }
  func.func @transform_1(%arg0: i32) -> (i32, i32) {
    %c0_i32 = arith.constant 0 : i32
    %c0_i32_0 = arith.constant 0 : i32
    %c0_i32_1 = arith.constant 0 : i32
    return %c0_i32, %c0_i32_0 : i32, i32
  }
  func.func @transform_2(%arg0: i32) -> (i32, i32) {
    %c0_i32 = arith.constant 0 : i32
    %c0_i32_0 = arith.constant 0 : i32
    %c0_i32_1 = arith.constant 0 : i32
    return %c0_i32, %c0_i32_0 : i32, i32
  }
  func.func @transform_3(%arg0: i32) -> (i32, i32) {
    %c0_i32 = arith.constant 0 : i32
    %c0_i32_0 = arith.constant 0 : i32
    return %arg0, %c0_i32 : i32, i32
  }
}

module attributes {stable_mosaic.version = 11 : i64} {
  func.func @_dense_kernel(%arg0: i32, %arg1: i32, %arg2: memref<16x32xbf16, #tpu.memory_space<vmem>>, %arg3: memref<32x96xbf16, #tpu.memory_space<vmem>>, %arg4: memref<1x96xf32, #tpu.memory_space<vmem>>, %arg5: memref<16x96xbf16, #tpu.memory_space<vmem>>) attributes {dimension_semantics = [#tpu.dimension_semantics<parallel>, #tpu.dimension_semantics<parallel>], iteration_bounds = array<i64: 1, 1>, scalar_prefetch = 0 : i64, scratch_operands = 0 : i64, tpu.core_type = #tpu.core_type<tc>, window_params = [{transform_indices = @transform_0, window_bounds = array<i64: 16, 32>}, {transform_indices = @transform_1, window_bounds = array<i64: 32, 96>}, {transform_indices = @transform_2, window_bounds = array<i64: 1, 96>}, {transform_indices = @transform_3, window_bounds = array<i64: 16, 96>}]} {
    %c0 = arith.constant 0 : index
    %c0_0 = arith.constant 0 : index
    %0 = vector.load %arg2[%c0, %c0_0] : memref<16x32xbf16, #tpu.memory_space<vmem>>, vector<16x32xbf16>
    %c0_1 = arith.constant 0 : index
    %c0_2 = arith.constant 0 : index
    %1 = vector.load %arg3[%c0_1, %c0_2] : memref<32x96xbf16, #tpu.memory_space<vmem>>, vector<32x96xbf16>
    %cst = arith.constant dense<0.000000e+00> : vector<16x96xf32>
    %2 = tpu.matmul %0, %1, %cst {dimension_numbers = #tpu.dot_dimension_numbers<[1], [0], [0], [1], [0, 0, 1, 1], [], []>} : vector<16x32xbf16>, vector<32x96xbf16>, vector<16x96xf32> -> vector<16x96xf32>
    %c0_3 = arith.constant 0 : index
    %c0_4 = arith.constant 0 : index
    %3 = vector.load %arg4[%c0_3, %c0_4] : memref<1x96xf32, #tpu.memory_space<vmem>>, vector<1x96xf32>
    %4 = vector.broadcast %3 : vector<1x96xf32> to vector<16x96xf32>
    %5 = arith.addf %2, %4 : vector<16x96xf32>
    %6 = arith.truncf %5 : vector<16x96xf32> to vector<16x96xbf16>
    %c0_5 = arith.constant 0 : index
    %c0_6 = arith.constant 0 : index
    %7 = vector.load %arg5[%c0_5, %c0_6] : memref<16x96xbf16, #tpu.memory_space<vmem>>, vector<16x96xbf16>
    tpu.vector_store %arg5[%c0_5, %c0_6], %6 {strides = array<i32>} : memref<16x96xbf16, #tpu.memory_space<vmem>>, vector<16x96xbf16>,
    return
  }
  func.func @transform_0(%arg0: i32, %arg1: i32) -> (i32, i32) {
    %c0_i32 = arith.constant 0 : i32
    %c0_i32_0 = arith.constant 0 : i32
    return %arg0, %c0_i32 : i32, i32
  }
  func.func @transform_1(%arg0: i32, %arg1: i32) -> (i32, i32) {
    %c0_i32 = arith.constant 0 : i32
    %c0_i32_0 = arith.constant 0 : i32
    return %c0_i32, %arg1 : i32, i32
  }
  func.func @transform_2(%arg0: i32, %arg1: i32) -> (i32, i32) {
    %c0_i32 = arith.constant 0 : i32
    %c0_i32_0 = arith.constant 0 : i32
    return %c0_i32, %arg1 : i32, i32
  }
  func.func @transform_3(%arg0: i32, %arg1: i32) -> (i32, i32) {
    %c0_i32 = arith.constant 0 : i32
    return %arg0, %arg1 : i32, i32
  }
}

module attributes {stable_mosaic.version = 11 : i64} {
  func.func @_attn_kernel(%arg0: i32, %arg1: i32, %arg2: i32, %arg3: memref<1x2x8x16xbf16, #tpu.memory_space<vmem>>, %arg4: memref<1x2x8x16xbf16, #tpu.memory_space<vmem>>, %arg5: memref<1x2x8x16xbf16, #tpu.memory_space<vmem>>, %arg6: memref<1x1x8xf32, #tpu.memory_space<vmem>>, %arg7: memref<1x2x8x16xbf16, #tpu.memory_space<vmem>>) attributes {dimension_semantics = [#tpu.dimension_semantics<parallel>, #tpu.dimension_semantics<parallel>, #tpu.dimension_semantics<parallel>], iteration_bounds = array<i64: 2, 1, 1>, scalar_prefetch = 0 : i64, scratch_operands = 0 : i64, tpu.core_type = #tpu.core_type<tc>, window_params = [{transform_indices = @transform_0, window_bounds = array<i64: 1, 2, 8, 16>}, {transform_indices = @transform_1, window_bounds = array<i64: 1, 2, 8, 16>}, {transform_indices = @transform_2, window_bounds = array<i64: 1, 2, 8, 16>}, {transform_indices = @transform_3, window_bounds = array<i64: 1, 1, 8>}, {transform_indices = @transform_4, window_bounds = array<i64: 1, 2, 8, 16>}]} {
    %c0 = arith.constant 0 : index
    %c0_0 = arith.constant 0 : index
    %c0_1 = arith.constant 0 : index
    %c0_2 = arith.constant 0 : index
    %0 = vector.load %arg3[%c0, %c0_0, %c0_1, %c0_2] : memref<1x2x8x16xbf16, #tpu.memory_space<vmem>>, vector<1x2x8x16xbf16>
    %1 = vector.shape_cast %0 : vector<1x2x8x16xbf16> to vector<2x8x16xbf16>
    %cst = arith.constant 2.500000e-01 : bf16
    %2 = vector.broadcast %cst : bf16 to vector<2x8x16xbf16>
    %3 = arith.mulf %1, %2 : vector<2x8x16xbf16>
    %c0_3 = arith.constant 0 : index
    %c0_4 = arith.constant 0 : index
    %c0_5 = arith.constant 0 : index
    %c0_6 = arith.constant 0 : index
    %4 = vector.load %arg4[%c0_3, %c0_4, %c0_5, %c0_6] : memref<1x2x8x16xbf16, #tpu.memory_space<vmem>>, vector<1x2x8x16xbf16>
    %5 = vector.shape_cast %4 : vector<1x2x8x16xbf16> to vector<2x8x16xbf16>
    %c0_7 = arith.constant 0 : index
    %c0_8 = arith.constant 0 : index
    %c0_9 = arith.constant 0 : index
    %c0_10 = arith.constant 0 : index
    %6 = vector.load %arg5[%c0_7, %c0_8, %c0_9, %c0_10] : memref<1x2x8x16xbf16, #tpu.memory_space<vmem>>, vector<1x2x8x16xbf16>
    %7 = vector.shape_cast %6 : vector<1x2x8x16xbf16> to vector<2x8x16xbf16>
    %c0_11 = arith.constant 0 : index
    %c0_12 = arith.constant 0 : index
    %c0_13 = arith.constant 0 : index
    %8 = vector.load %arg6[%c0_11, %c0_12, %c0_13] : memref<1x1x8xf32, #tpu.memory_space<vmem>>, vector<1x1x8xf32>
    %9 = vector.shape_cast %8 : vector<1x1x8xf32> to vector<1x8xf32>
    "tpu.trace_start"() <{level = 10 : i32, message = "gqd,gkd->gqk"}> : () -> ()
    %cst_14 = arith.constant dense<0.000000e+00> : vector<2x8x8xf32>
    %10 = tpu.matmul %3, %5, %cst_14 {dimension_numbers = #tpu.dot_dimension_numbers<[2], [2], [1], [1], [0, 0, 0, 1, 1, 1], [0], [0]>} : vector<2x8x16xbf16>, vector<2x8x16xbf16>, vector<2x8x8xf32> -> vector<2x8x8xf32>
    "tpu.trace_stop"() : () -> ()
    %11 = vector.shape_cast %9 : vector<1x8xf32> to vector<1x1x8xf32>
    %12 = vector.broadcast %11 : vector<1x1x8xf32> to vector<2x8x8xf32>
    %13 = arith.addf %10, %12 : vector<2x8x8xf32>
    %cst_15 = arith.constant dense<0xFF800000> : vector<2x8xf32>
    %14 = vector.multi_reduction <maximumf>, %13, %cst_15 [2] : vector<2x8x8xf32> to vector<2x8xf32>
    %15 = vector.shape_cast %14 : vector<2x8xf32> to vector<2x8x1xf32>
    %16 = vector.broadcast %15 : vector<2x8x1xf32> to vector<2x8x8xf32>
    %17 = arith.subf %13, %16 : vector<2x8x8xf32>
    %18 = math.exp %17 : vector<2x8x8xf32>
    %cst_16 = arith.constant dense<0.000000e+00> : vector<2x8xf32>
    %19 = vector.multi_reduction <add>, %18, %cst_16 [2] : vector<2x8x8xf32> to vector<2x8xf32>
    %20 = vector.shape_cast %19 : vector<2x8xf32> to vector<2x8x1xf32>
    %21 = tpu.reciprocal %20 {approx = true} : vector<2x8x1xf32> -> vector<2x8x1xf32>
    %22 = vector.broadcast %21 : vector<2x8x1xf32> to vector<2x8x8xf32>
    %23 = arith.mulf %18, %22 : vector<2x8x8xf32>
    %24 = arith.truncf %23 : vector<2x8x8xf32> to vector<2x8x8xbf16>
    "tpu.trace_start"() <{level = 10 : i32, message = "gqk,gkd->gqd"}> : () -> ()
    %cst_17 = arith.constant dense<0.000000e+00> : vector<2x8x16xf32>
    %25 = tpu.matmul %24, %7, %cst_17 {dimension_numbers = #tpu.dot_dimension_numbers<[2], [1], [1], [2], [0, 0, 0, 1, 1, 2], [0], [0]>} : vector<2x8x8xbf16>, vector<2x8x16xbf16>, vector<2x8x16xf32> -> vector<2x8x16xf32>
    "tpu.trace_stop"() : () -> ()
    %26 = arith.truncf %25 : vector<2x8x16xf32> to vector<2x8x16xbf16>
    %c0_18 = arith.constant 0 : index
    %c0_19 = arith.constant 0 : index
    %c0_20 = arith.constant 0 : index
    %c0_21 = arith.constant 0 : index
    %27 = vector.load %arg7[%c0_18, %c0_19, %c0_20, %c0_21] : memref<1x2x8x16xbf16, #tpu.memory_space<vmem>>, vector<1x2x8x16xbf16>
    %28 = vector.shape_cast %27 : vector<1x2x8x16xbf16> to vector<2x8x16xbf16>
    %29 = vector.shape_cast %26 : vector<2x8x16xbf16> to vector<1x2x8x16xbf16>
    tpu.vector_store %arg7[%c0_18, %c0_19, %c0_20, %c0_21], %29 {strides = array<i32>} : memref<1x2x8x16xbf16, #tpu.memory_space<vmem>>, vector<1x2x8x16xbf16>,
    return
  }
  func.func @transform_0(%arg0: i32, %arg1: i32, %arg2: i32) -> (i32, i32, i32, i32) {
    %c0_i32 = arith.constant 0 : i32
    %c0_i32_0 = arith.constant 0 : i32
    return %arg0, %arg1, %arg2, %c0_i32 : i32, i32, i32, i32
  }
  func.func @transform_1(%arg0: i32, %arg1: i32, %arg2: i32) -> (i32, i32, i32, i32) {
    %c0_i32 = arith.constant 0 : i32
    %c0_i32_0 = arith.constant 0 : i32
    %c0_i32_1 = arith.constant 0 : i32
    return %arg0, %arg1, %c0_i32, %c0_i32_0 : i32, i32, i32, i32
  }
  func.func @transform_2(%arg0: i32, %arg1: i32, %arg2: i32) -> (i32, i32, i32, i32) {
    %c0_i32 = arith.constant 0 : i32
    %c0_i32_0 = arith.constant 0 : i32
    %c0_i32_1 = arith.constant 0 : i32
    return %arg0, %arg1, %c0_i32, %c0_i32_0 : i32, i32, i32, i32
  }
  func.func @transform_3(%arg0: i32, %arg1: i32, %arg2: i32) -> (i32, i32, i32) {
    %c0_i32 = arith.constant 0 : i32
    %c0_i32_0 = arith.constant 0 : i32
    %c0_i32_1 = arith.constant 0 : i32
    return %arg0, %c0_i32, %c0_i32_0 : i32, i32, i32
  }
  func.func @transform_4(%arg0: i32, %arg1: i32, %arg2: i32) -> (i32, i32, i32, i32) {
    %c0_i32 = arith.constant 0 : i32
    %c0_i32_0 = arith.constant 0 : i32
    return %arg0, %arg1, %arg2, %c0_i32 : i32, i32, i32, i32
  }
}

module attributes {stable_mosaic.version = 11 : i64} {
  func.func @_dense_ln_kernel(%arg0: i32, %arg1: i32, %arg2: memref<16x32xbf16, #tpu.memory_space<vmem>>, %arg3: memref<32x32xbf16, #tpu.memory_space<vmem>>, %arg4: memref<1x32xf32, #tpu.memory_space<vmem>>, %arg5: memref<16x32xbf16, #tpu.memory_space<vmem>>, %arg6: memref<1x32xf32, #tpu.memory_space<vmem>>, %arg7: memref<1x32xf32, #tpu.memory_space<vmem>>, %arg8: memref<16x32xbf16, #tpu.memory_space<vmem>>) attributes {dimension_semantics = [#tpu.dimension_semantics<parallel>, #tpu.dimension_semantics<parallel>], iteration_bounds = array<i64: 1, 1>, scalar_prefetch = 0 : i64, scratch_operands = 0 : i64, tpu.core_type = #tpu.core_type<tc>, window_params = [{transform_indices = @transform_0, window_bounds = array<i64: 16, 32>}, {transform_indices = @transform_1, window_bounds = array<i64: 32, 32>}, {transform_indices = @transform_2, window_bounds = array<i64: 1, 32>}, {transform_indices = @transform_3, window_bounds = array<i64: 16, 32>}, {transform_indices = @transform_4, window_bounds = array<i64: 1, 32>}, {transform_indices = @transform_5, window_bounds = array<i64: 1, 32>}, {transform_indices = @transform_6, window_bounds = array<i64: 16, 32>}]} {
    %c0 = arith.constant 0 : index
    %c0_0 = arith.constant 0 : index
    %0 = vector.load %arg2[%c0, %c0_0] : memref<16x32xbf16, #tpu.memory_space<vmem>>, vector<16x32xbf16>
    %c0_1 = arith.constant 0 : index
    %c0_2 = arith.constant 0 : index
    %1 = vector.load %arg3[%c0_1, %c0_2] : memref<32x32xbf16, #tpu.memory_space<vmem>>, vector<32x32xbf16>
    %cst = arith.constant dense<0.000000e+00> : vector<16x32xf32>
    %2 = tpu.matmul %0, %1, %cst {dimension_numbers = #tpu.dot_dimension_numbers<[1], [0], [0], [1], [0, 0, 1, 1], [], []>} : vector<16x32xbf16>, vector<32x32xbf16>, vector<16x32xf32> -> vector<16x32xf32>
    %c0_3 = arith.constant 0 : index
    %c0_4 = arith.constant 0 : index
    %3 = vector.load %arg4[%c0_3, %c0_4] : memref<1x32xf32, #tpu.memory_space<vmem>>, vector<1x32xf32>
    %4 = vector.broadcast %3 : vector<1x32xf32> to vector<16x32xf32>
    %5 = arith.addf %2, %4 : vector<16x32xf32>
    %c0_5 = arith.constant 0 : index
    %c0_6 = arith.constant 0 : index
    %6 = vector.load %arg5[%c0_5, %c0_6] : memref<16x32xbf16, #tpu.memory_space<vmem>>, vector<16x32xbf16>
    %7 = arith.extf %6 : vector<16x32xbf16> to vector<16x32xf32>
    %8 = arith.addf %5, %7 : vector<16x32xf32>
    %c0_7 = arith.constant 0 : index
    %c0_8 = arith.constant 0 : index
    %9 = vector.load %arg6[%c0_7, %c0_8] : memref<1x32xf32, #tpu.memory_space<vmem>>, vector<1x32xf32>
    %c0_9 = arith.constant 0 : index
    %c0_10 = arith.constant 0 : index
    %10 = vector.load %arg7[%c0_9, %c0_10] : memref<1x32xf32, #tpu.memory_space<vmem>>, vector<1x32xf32>
    %cst_11 = arith.constant dense<0.000000e+00> : vector<16xf32>
    %11 = vector.multi_reduction <add>, %8, %cst_11 [1] : vector<16x32xf32> to vector<16xf32>
    %12 = vector.shape_cast %11 : vector<16xf32> to vector<16x1xf32>
    %cst_12 = arith.constant 3.200000e+01 : f32
    %13 = vector.broadcast %cst_12 : f32 to vector<16x1xf32>
    %14 = arith.divf %12, %13 : vector<16x1xf32>
    %15 = vector.broadcast %14 : vector<16x1xf32> to vector<16x32xf32>
    %16 = arith.subf %8, %15 : vector<16x32xf32>
    %17 = arith.mulf %16, %16 : vector<16x32xf32>
    %cst_13 = arith.constant dense<0.000000e+00> : vector<16xf32>
    %18 = vector.multi_reduction <add>, %17, %cst_13 [1] : vector<16x32xf32> to vector<16xf32>
    %19 = vector.shape_cast %18 : vector<16xf32> to vector<16x1xf32>
    %cst_14 = arith.constant 3.200000e+01 : f32
    %20 = vector.broadcast %cst_14 : f32 to vector<16x1xf32>
    %21 = arith.divf %19, %20 : vector<16x1xf32>
    %cst_15 = arith.constant 9.99999996E-13 : f32
    %22 = vector.broadcast %cst_15 : f32 to vector<16x1xf32>
    %23 = arith.addf %21, %22 : vector<16x1xf32>
    %24 = math.rsqrt %23 : vector<16x1xf32>
    %25 = vector.broadcast %14 : vector<16x1xf32> to vector<16x32xf32>
    %26 = arith.subf %8, %25 : vector<16x32xf32>
    %27 = vector.broadcast %24 : vector<16x1xf32> to vector<16x32xf32>
    %28 = arith.mulf %26, %27 : vector<16x32xf32>
    %29 = vector.broadcast %9 : vector<1x32xf32> to vector<16x32xf32>
    %30 = arith.mulf %28, %29 : vector<16x32xf32>
    %31 = vector.broadcast %10 : vector<1x32xf32> to vector<16x32xf32>
    %32 = arith.addf %30, %31 : vector<16x32xf32>
    %33 = arith.truncf %32 : vector<16x32xf32> to vector<16x32xbf16>
    %c0_16 = arith.constant 0 : index
    %c0_17 = arith.constant 0 : index
    %34 = vector.load %arg8[%c0_16, %c0_17] : memref<16x32xbf16, #tpu.memory_space<vmem>>, vector<16x32xbf16>
    tpu.vector_store %arg8[%c0_16, %c0_17], %33 {strides = array<i32>} : memref<16x32xbf16, #tpu.memory_space<vmem>>, vector<16x32xbf16>,
    return
  }
  func.func @transform_0(%arg0: i32, %arg1: i32) -> (i32, i32) {
    %c0_i32 = arith.constant 0 : i32
    %c0_i32_0 = arith.constant 0 : i32
    return %arg0, %c0_i32 : i32, i32
  }
  func.func @transform_1(%arg0: i32, %arg1: i32) -> (i32, i32) {
    %c0_i32 = arith.constant 0 : i32
    %c0_i32_0 = arith.constant 0 : i32
    return %c0_i32, %arg1 : i32, i32
  }
  func.func @transform_2(%arg0: i32, %arg1: i32) -> (i32, i32) {
    %c0_i32 = arith.constant 0 : i32
    %c0_i32_0 = arith.constant 0 : i32
    return %c0_i32, %arg1 : i32, i32
  }
  func.func @transform_3(%arg0: i32, %arg1: i32) -> (i32, i32) {
    %c0_i32 = arith.constant 0 : i32
    return %arg0, %arg1 : i32, i32
  }
  func.func @transform_4(%arg0: i32, %arg1: i32) -> (i32, i32) {
    %c0_i32 = arith.constant 0 : i32
    %c0_i32_0 = arith.constant 0 : i32
    return %c0_i32, %arg1 : i32, i32
  }
  func.func @transform_5(%arg0: i32, %arg1: i32) -> (i32, i32) {
    %c0_i32 = arith.constant 0 : i32
    %c0_i32_0 = arith.constant 0 : i32
    return %c0_i32, %arg1 : i32, i32
  }
  func.func @transform_6(%arg0: i32, %arg1: i32) -> (i32, i32) {
    %c0_i32 = arith.constant 0 : i32
    return %arg0, %arg1 : i32, i32
  }
}

module attributes {stable_mosaic.version = 11 : i64} {
  func.func @_dense_ln_kernel(%arg0: i32, %arg1: i32, %arg2: memref<16x64xbf16, #tpu.memory_space<vmem>>, %arg3: memref<64x32xbf16, #tpu.memory_space<vmem>>, %arg4: memref<1x32xf32, #tpu.memory_space<vmem>>, %arg5: memref<16x32xbf16, #tpu.memory_space<vmem>>, %arg6: memref<1x32xf32, #tpu.memory_space<vmem>>, %arg7: memref<1x32xf32, #tpu.memory_space<vmem>>, %arg8: memref<16x32xbf16, #tpu.memory_space<vmem>>) attributes {dimension_semantics = [#tpu.dimension_semantics<parallel>, #tpu.dimension_semantics<parallel>], iteration_bounds = array<i64: 1, 1>, scalar_prefetch = 0 : i64, scratch_operands = 0 : i64, tpu.core_type = #tpu.core_type<tc>, window_params = [{transform_indices = @transform_0, window_bounds = array<i64: 16, 64>}, {transform_indices = @transform_1, window_bounds = array<i64: 64, 32>}, {transform_indices = @transform_2, window_bounds = array<i64: 1, 32>}, {transform_indices = @transform_3, window_bounds = array<i64: 16, 32>}, {transform_indices = @transform_4, window_bounds = array<i64: 1, 32>}, {transform_indices = @transform_5, window_bounds = array<i64: 1, 32>}, {transform_indices = @transform_6, window_bounds = array<i64: 16, 32>}]} {
    %c0 = arith.constant 0 : index
    %c0_0 = arith.constant 0 : index
    %0 = vector.load %arg2[%c0, %c0_0] : memref<16x64xbf16, #tpu.memory_space<vmem>>, vector<16x64xbf16>
    %c0_1 = arith.constant 0 : index
    %c0_2 = arith.constant 0 : index
    %1 = vector.load %arg3[%c0_1, %c0_2] : memref<64x32xbf16, #tpu.memory_space<vmem>>, vector<64x32xbf16>
    %cst = arith.constant dense<0.000000e+00> : vector<16x32xf32>
    %2 = tpu.matmul %0, %1, %cst {dimension_numbers = #tpu.dot_dimension_numbers<[1], [0], [0], [1], [0, 0, 1, 1], [], []>} : vector<16x64xbf16>, vector<64x32xbf16>, vector<16x32xf32> -> vector<16x32xf32>
    %c0_3 = arith.constant 0 : index
    %c0_4 = arith.constant 0 : index
    %3 = vector.load %arg4[%c0_3, %c0_4] : memref<1x32xf32, #tpu.memory_space<vmem>>, vector<1x32xf32>
    %4 = vector.broadcast %3 : vector<1x32xf32> to vector<16x32xf32>
    %5 = arith.addf %2, %4 : vector<16x32xf32>
    %c0_5 = arith.constant 0 : index
    %c0_6 = arith.constant 0 : index
    %6 = vector.load %arg5[%c0_5, %c0_6] : memref<16x32xbf16, #tpu.memory_space<vmem>>, vector<16x32xbf16>
    %7 = arith.extf %6 : vector<16x32xbf16> to vector<16x32xf32>
    %8 = arith.addf %5, %7 : vector<16x32xf32>
    %c0_7 = arith.constant 0 : index
    %c0_8 = arith.constant 0 : index
    %9 = vector.load %arg6[%c0_7, %c0_8] : memref<1x32xf32, #tpu.memory_space<vmem>>, vector<1x32xf32>
    %c0_9 = arith.constant 0 : index
    %c0_10 = arith.constant 0 : index
    %10 = vector.load %arg7[%c0_9, %c0_10] : memref<1x32xf32, #tpu.memory_space<vmem>>, vector<1x32xf32>
    %cst_11 = arith.constant dense<0.000000e+00> : vector<16xf32>
    %11 = vector.multi_reduction <add>, %8, %cst_11 [1] : vector<16x32xf32> to vector<16xf32>
    %12 = vector.shape_cast %11 : vector<16xf32> to vector<16x1xf32>
    %cst_12 = arith.constant 3.200000e+01 : f32
    %13 = vector.broadcast %cst_12 : f32 to vector<16x1xf32>
    %14 = arith.divf %12, %13 : vector<16x1xf32>
    %15 = vector.broadcast %14 : vector<16x1xf32> to vector<16x32xf32>
    %16 = arith.subf %8, %15 : vector<16x32xf32>
    %17 = arith.mulf %16, %16 : vector<16x32xf32>
    %cst_13 = arith.constant dense<0.000000e+00> : vector<16xf32>
    %18 = vector.multi_reduction <add>, %17, %cst_13 [1] : vector<16x32xf32> to vector<16xf32>
    %19 = vector.shape_cast %18 : vector<16xf32> to vector<16x1xf32>
    %cst_14 = arith.constant 3.200000e+01 : f32
    %20 = vector.broadcast %cst_14 : f32 to vector<16x1xf32>
    %21 = arith.divf %19, %20 : vector<16x1xf32>
    %cst_15 = arith.constant 9.99999996E-13 : f32
    %22 = vector.broadcast %cst_15 : f32 to vector<16x1xf32>
    %23 = arith.addf %21, %22 : vector<16x1xf32>
    %24 = math.rsqrt %23 : vector<16x1xf32>
    %25 = vector.broadcast %14 : vector<16x1xf32> to vector<16x32xf32>
    %26 = arith.subf %8, %25 : vector<16x32xf32>
    %27 = vector.broadcast %24 : vector<16x1xf32> to vector<16x32xf32>
    %28 = arith.mulf %26, %27 : vector<16x32xf32>
    %29 = vector.broadcast %9 : vector<1x32xf32> to vector<16x32xf32>
    %30 = arith.mulf %28, %29 : vector<16x32xf32>
    %31 = vector.broadcast %10 : vector<1x32xf32> to vector<16x32xf32>
    %32 = arith.addf %30, %31 : vector<16x32xf32>
    %33 = arith.truncf %32 : vector<16x32xf32> to vector<16x32xbf16>
    %c0_16 = arith.constant 0 : index
    %c0_17 = arith.constant 0 : index
    %34 = vector.load %arg8[%c0_16, %c0_17] : memref<16x32xbf16, #tpu.memory_space<vmem>>, vector<16x32xbf16>
    tpu.vector_store %arg8[%c0_16, %c0_17], %33 {strides = array<i32>} : memref<16x32xbf16, #tpu.memory_space<vmem>>, vector<16x32xbf16>,
    return
  }
  func.func @transform_0(%arg0: i32, %arg1: i32) -> (i32, i32) {
    %c0_i32 = arith.constant 0 : i32
    %c0_i32_0 = arith.constant 0 : i32
    return %arg0, %c0_i32 : i32, i32
  }
  func.func @transform_1(%arg0: i32, %arg1: i32) -> (i32, i32) {
    %c0_i32 = arith.constant 0 : i32
    %c0_i32_0 = arith.constant 0 : i32
    return %c0_i32, %arg1 : i32, i32
  }
  func.func @transform_2(%arg0: i32, %arg1: i32) -> (i32, i32) {
    %c0_i32 = arith.constant 0 : i32
    %c0_i32_0 = arith.constant 0 : i32
    return %c0_i32, %arg1 : i32, i32
  }
  func.func @transform_3(%arg0: i32, %arg1: i32) -> (i32, i32) {
    %c0_i32 = arith.constant 0 : i32
    return %arg0, %arg1 : i32, i32
  }
  func.func @transform_4(%arg0: i32, %arg1: i32) -> (i32, i32) {
    %c0_i32 = arith.constant 0 : i32
    %c0_i32_0 = arith.constant 0 : i32
    return %c0_i32, %arg1 : i32, i32
  }
  func.func @transform_5(%arg0: i32, %arg1: i32) -> (i32, i32) {
    %c0_i32 = arith.constant 0 : i32
    %c0_i32_0 = arith.constant 0 : i32
    return %c0_i32, %arg1 : i32, i32
  }
  func.func @transform_6(%arg0: i32, %arg1: i32) -> (i32, i32) {
    %c0_i32 = arith.constant 0 : i32
    return %arg0, %arg1 : i32, i32
  }
}

module attributes {stable_mosaic.version = 11 : i64} {
  func.func @_dense_kernel(%arg0: i32, %arg1: i32, %arg2: memref<16x32xbf16, #tpu.memory_space<vmem>>, %arg3: memref<32x64xbf16, #tpu.memory_space<vmem>>, %arg4: memref<1x64xf32, #tpu.memory_space<vmem>>, %arg5: memref<16x64xbf16, #tpu.memory_space<vmem>>) attributes {dimension_semantics = [#tpu.dimension_semantics<parallel>, #tpu.dimension_semantics<parallel>], iteration_bounds = array<i64: 1, 1>, scalar_prefetch = 0 : i64, scratch_operands = 0 : i64, tpu.core_type = #tpu.core_type<tc>, window_params = [{transform_indices = @transform_0, window_bounds = array<i64: 16, 32>}, {transform_indices = @transform_1, window_bounds = array<i64: 32, 64>}, {transform_indices = @transform_2, window_bounds = array<i64: 1, 64>}, {transform_indices = @transform_3, window_bounds = array<i64: 16, 64>}]} {
    %c0 = arith.constant 0 : index
    %c0_0 = arith.constant 0 : index
    %0 = vector.load %arg2[%c0, %c0_0] : memref<16x32xbf16, #tpu.memory_space<vmem>>, vector<16x32xbf16>
    %c0_1 = arith.constant 0 : index
    %c0_2 = arith.constant 0 : index
    %1 = vector.load %arg3[%c0_1, %c0_2] : memref<32x64xbf16, #tpu.memory_space<vmem>>, vector<32x64xbf16>
    %cst = arith.constant dense<0.000000e+00> : vector<16x64xf32>
    %2 = tpu.matmul %0, %1, %cst {dimension_numbers = #tpu.dot_dimension_numbers<[1], [0], [0], [1], [0, 0, 1, 1], [], []>} : vector<16x32xbf16>, vector<32x64xbf16>, vector<16x64xf32> -> vector<16x64xf32>
    %c0_3 = arith.constant 0 : index
    %c0_4 = arith.constant 0 : index
    %3 = vector.load %arg4[%c0_3, %c0_4] : memref<1x64xf32, #tpu.memory_space<vmem>>, vector<1x64xf32>
    %4 = vector.broadcast %3 : vector<1x64xf32> to vector<16x64xf32>
    %5 = arith.addf %2, %4 : vector<16x64xf32>
    %6 = arith.mulf %5, %5 : vector<16x64xf32>
    %7 = arith.mulf %5, %6 : vector<16x64xf32>
    %cst_5 = arith.constant 4.471500e-02 : f32
    %8 = vector.broadcast %cst_5 : f32 to vector<16x64xf32>
    %9 = arith.mulf %8, %7 : vector<16x64xf32>
    %10 = arith.addf %5, %9 : vector<16x64xf32>
    %cst_6 = arith.constant 0.797884583 : f32
    %11 = vector.broadcast %cst_6 : f32 to vector<16x64xf32>
    %12 = arith.mulf %11, %10 : vector<16x64xf32>
    %13 = math.tanh %12 : vector<16x64xf32>
    %cst_7 = arith.constant 1.000000e+00 : f32
    %14 = vector.broadcast %cst_7 : f32 to vector<16x64xf32>
    %15 = arith.addf %14, %13 : vector<16x64xf32>
    %cst_8 = arith.constant 5.000000e-01 : f32
    %16 = vector.broadcast %cst_8 : f32 to vector<16x64xf32>
    %17 = arith.mulf %16, %15 : vector<16x64xf32>
    %18 = arith.mulf %5, %17 : vector<16x64xf32>
    %19 = arith.truncf %18 : vector<16x64xf32> to vector<16x64xbf16>
    %c0_9 = arith.constant 0 : index
    %c0_10 = arith.constant 0 : index
    %20 = vector.load %arg5[%c0_9, %c0_10] : memref<16x64xbf16, #tpu.memory_space<vmem>>, vector<16x64xbf16>
    tpu.vector_store %arg5[%c0_9, %c0_10], %19 {strides = array<i32>} : memref<16x64xbf16, #tpu.memory_space<vmem>>, vector<16x64xbf16>,
    return
  }
  func.func @transform_0(%arg0: i32, %arg1: i32) -> (i32, i32) {
    %c0_i32 = arith.constant 0 : i32
    %c0_i32_0 = arith.constant 0 : i32
    return %arg0, %c0_i32 : i32, i32
  }
  func.func @transform_1(%arg0: i32, %arg1: i32) -> (i32, i32) {
    %c0_i32 = arith.constant 0 : i32
    %c0_i32_0 = arith.constant 0 : i32
    return %c0_i32, %arg1 : i32, i32
  }
  func.func @transform_2(%arg0: i32, %arg1: i32) -> (i32, i32) {
    %c0_i32 = arith.constant 0 : i32
    %c0_i32_0 = arith.constant 0 : i32
    return %c0_i32, %arg1 : i32, i32
  }
  func.func @transform_3(%arg0: i32, %arg1: i32) -> (i32, i32) {
    %c0_i32 = arith.constant 0 : i32
    return %arg0, %arg1 : i32, i32
  }
}

module attributes {stable_mosaic.version = 11 : i64} {
  func.func @_mlp_head_kernel(%arg0: i32, %arg1: memref<2x32xbf16, #tpu.memory_space<vmem>>, %arg2: memref<32x16xbf16, #tpu.memory_space<vmem>>, %arg3: memref<1x16xf32, #tpu.memory_space<vmem>>, %arg4: memref<16x1xbf16, #tpu.memory_space<vmem>>, %arg5: memref<1x1xf32, #tpu.memory_space<vmem>>, %arg6: memref<2x1xf32, #tpu.memory_space<vmem>>) attributes {dimension_semantics = [#tpu.dimension_semantics<arbitrary>], iteration_bounds = array<i64: 1>, scalar_prefetch = 0 : i64, scratch_operands = 0 : i64, tpu.core_type = #tpu.core_type<tc>, window_params = [{pipeline_mode = #tpu.pipeline_mode<synchronous>, transform_indices = @transform_0, window_bounds = array<i64: 2, 32>}, {pipeline_mode = #tpu.pipeline_mode<synchronous>, transform_indices = @transform_1, window_bounds = array<i64: 32, 16>}, {pipeline_mode = #tpu.pipeline_mode<synchronous>, transform_indices = @transform_2, window_bounds = array<i64: 1, 16>}, {pipeline_mode = #tpu.pipeline_mode<synchronous>, transform_indices = @transform_3, window_bounds = array<i64: 16, 1>}, {pipeline_mode = #tpu.pipeline_mode<synchronous>, transform_indices = @transform_4, window_bounds = array<i64: 1, 1>}, {pipeline_mode = #tpu.pipeline_mode<synchronous>, transform_indices = @transform_5, window_bounds = array<i64: 2, 1>}]} {
    %c0 = arith.constant 0 : index
    %c0_0 = arith.constant 0 : index
    %0 = vector.load %arg1[%c0, %c0_0] : memref<2x32xbf16, #tpu.memory_space<vmem>>, vector<2x32xbf16>
    %c0_1 = arith.constant 0 : index
    %c0_2 = arith.constant 0 : index
    %1 = vector.load %arg2[%c0_1, %c0_2] : memref<32x16xbf16, #tpu.memory_space<vmem>>, vector<32x16xbf16>
    %cst = arith.constant dense<0.000000e+00> : vector<2x16xf32>
    %2 = tpu.matmul %0, %1, %cst {dimension_numbers = #tpu.dot_dimension_numbers<[1], [0], [0], [1], [0, 0, 1, 1], [], []>} : vector<2x32xbf16>, vector<32x16xbf16>, vector<2x16xf32> -> vector<2x16xf32>
    %c0_3 = arith.constant 0 : index
    %c0_4 = arith.constant 0 : index
    %3 = vector.load %arg3[%c0_3, %c0_4] : memref<1x16xf32, #tpu.memory_space<vmem>>, vector<1x16xf32>
    %4 = vector.broadcast %3 : vector<1x16xf32> to vector<2x16xf32>
    %5 = arith.addf %2, %4 : vector<2x16xf32>
    %cst_5 = arith.constant 0.000000e+00 : f32
    %6 = vector.broadcast %cst_5 : f32 to vector<2x16xf32>
    %7 = arith.maximumf %5, %6 : vector<2x16xf32>
    %8 = arith.truncf %7 : vector<2x16xf32> to vector<2x16xbf16>
    %c0_6 = arith.constant 0 : index
    %c0_7 = arith.constant 0 : index
    %9 = vector.load %arg4[%c0_6, %c0_7] : memref<16x1xbf16, #tpu.memory_space<vmem>>, vector<16x1xbf16>
    %cst_8 = arith.constant dense<0.000000e+00> : vector<2x1xf32>
    %10 = tpu.matmul %8, %9, %cst_8 {dimension_numbers = #tpu.dot_dimension_numbers<[1], [0], [0], [1], [0, 0, 1, 1], [], []>} : vector<2x16xbf16>, vector<16x1xbf16>, vector<2x1xf32> -> vector<2x1xf32>
    %c0_9 = arith.constant 0 : index
    %c0_10 = arith.constant 0 : index
    %11 = vector.load %arg5[%c0_9, %c0_10] : memref<1x1xf32, #tpu.memory_space<vmem>>, vector<1x1xf32>
    %12 = vector.broadcast %11 : vector<1x1xf32> to vector<2x1xf32>
    %13 = arith.addf %10, %12 : vector<2x1xf32>
    %14 = arith.negf %13 : vector<2x1xf32>
    %15 = math.exp %14 : vector<2x1xf32>
    %cst_11 = arith.constant 1.000000e+00 : f32
    %16 = vector.broadcast %cst_11 : f32 to vector<2x1xf32>
    %17 = arith.addf %16, %15 : vector<2x1xf32>
    %18 = arith.divf %16, %17 : vector<2x1xf32>
    %c0_12 = arith.constant 0 : index
    %c0_13 = arith.constant 0 : index
    %19 = vector.load %arg6[%c0_12, %c0_13] : memref<2x1xf32, #tpu.memory_space<vmem>>, vector<2x1xf32>
    tpu.vector_store %arg6[%c0_12, %c0_13], %18 {strides = array<i32>} : memref<2x1xf32, #tpu.memory_space<vmem>>, vector<2x1xf32>,
    return
  }
  func.func @transform_0(%arg0: i32) -> (i32, i32) {
    %c0_i32 = arith.constant 0 : i32
    %c0_i32_0 = arith.constant 0 : i32
    %c0_i32_1 = arith.constant 0 : i32
    return %c0_i32, %c0_i32_0 : i32, i32
  }
  func.func @transform_1(%arg0: i32) -> (i32, i32) {
    %c0_i32 = arith.constant 0 : i32
    %c0_i32_0 = arith.constant 0 : i32
    %c0_i32_1 = arith.constant 0 : i32
    return %c0_i32, %c0_i32_0 : i32, i32
  }
  func.func @transform_2(%arg0: i32) -> (i32, i32) {
    %c0_i32 = arith.constant 0 : i32
    %c0_i32_0 = arith.constant 0 : i32
    %c0_i32_1 = arith.constant 0 : i32
    return %c0_i32, %c0_i32_0 : i32, i32
  }
  func.func @transform_3(%arg0: i32) -> (i32, i32) {
    %c0_i32 = arith.constant 0 : i32
    %c0_i32_0 = arith.constant 0 : i32
    %c0_i32_1 = arith.constant 0 : i32
    return %c0_i32, %c0_i32_0 : i32, i32
  }
  func.func @transform_4(%arg0: i32) -> (i32, i32) {
    %c0_i32 = arith.constant 0 : i32
    %c0_i32_0 = arith.constant 0 : i32
    %c0_i32_1 = arith.constant 0 : i32
    return %c0_i32, %c0_i32_0 : i32, i32
  }
  func.func @transform_5(%arg0: i32) -> (i32, i32) {
    %c0_i32 = arith.constant 0 : i32
    %c0_i32_0 = arith.constant 0 : i32
    %c0_i32_1 = arith.constant 0 : i32
    return %c0_i32, %c0_i32_0 : i32, i32
  }
}

</mosaic_0001>

<bundles_post_ra>
// kernel: bert_mlp_classifier.13
= control target key start
LH: loop header
LB: loop body
LE: loop exit
PB: predicated region body
PF: predicated region fallthrough
CT: control target
= control target key end

     0   :  { %v130_v0 = vmov 0.0   ;;  %vm131_vm0 = vmmov 0   ;;  %vm45_vm1 = vcmask 261120   ;;  %vm98_vm2 = vcmask 781312   ;;  %s170_s1 = inlined_call_operand.vmem [shape: bf16[32,96], index: 1, kind: input, shape index: {}]   ;;  %s171_s0 = inlined_call_operand.vmem [shape: bf16[16,32], index: 0, kind: input, shape index: {}]   ;;  %s172_s2 = inlined_call_operand.vmem [shape: f32[1,96], index: 2, kind: input, shape index: {}]   ;;  %s173_s3 = inlined_call_operand.vmem [shape: bf16[16,96], index: 3, kind: output, shape index: {}]  }
   0x1   :  { %117 = vmatprep.subr.bf16.mxu0 %v130_v0  ;;  %v127_v1 = vld [vmem:[%s170_s1] sm:$0xff]   ;;  %121 = vmatprep.mubr.msk.bf16.mxu0 %vm131_vm0, %v130_v0  ;;  %v128_v2 = vld [vmem:[%s170_s1 + $0x8] sm:$0xff]  }
   0x2   :  { %118 = vmatpush3.bf16.msra.mxu0 %v127_v1  ;;  %v129_v3 = vld [vmem:[%s171_s0] sm:$0xff]  }
   0x3   :  { %119 = vmatprep.subr.bf16.mxu0 %v130_v0  ;;  %v105_v4 = vld [vmem:[%s172_s2] ss:$0 sm:$0xff] }
   0x6   :  { %120 = vmatpush3.bf16.msra.mxu0 %v128_v2 }
   0x9   :  { %122 = vmatmul.mubr.msk.bf16.vlgmr.msra.gmra.mrb[0].mxu0 %vm45_vm1, %v129_v3 }
  0xdc   :  { %v83_v5 = vpop.f32.mrb[0].mxu0 }
  0xdd   :  { %v84_v6 = vadd.f32 %v105_v4, %v83_v5  ;;  %v123_v7 = vpop.f32.mrb[1].mxu0 }
  0xde   :  { %v86_v8 = vpop.f32.mrb[2].mxu0 }
  0xdf   :  { %v112_v9 = vpack.c.bf16 %v84_v6, %v84_v6  ;;  %v87_v10 = vadd.f32 %v105_v4, %v86_v8  ;;  %v124_v11 = vpop.f32.mrb[3].mxu0 }
  0xe1   :  { %99 = vst.msk [vmem:[%s173_s3] sm:$0xf] %vm98_vm2, %v112_v9  ;;  %v113_v12 = vpack.c.bf16 %v87_v10, %v87_v10 }
  0xe3   :  { %100 = vst.msk [vmem:[%s173_s3 + $0x4] sm:$0xf] %vm98_vm2, %v113_v12 }

// kernel: bert_mlp_classifier.12
= control target key start
LH: loop header
LB: loop body
LE: loop exit
PB: predicated region body
PF: predicated region fallthrough
CT: control target
= control target key end

     0   :  { %vm20_vm0 = vcmask 261120   ;;  %vm72_vm1 = vcmask 257024   ;;  %s132_s0 = inlined_call_operand.vmem [shape: bf16[16,32], index: 0, kind: input, shape index: {}]   ;;  %s133_s1 = inlined_call_operand.vmem [shape: f32[1,32], index: 1, kind: input, shape index: {}]   ;;  %s134_s2 = inlined_call_operand.vmem [shape: f32[1,32], index: 2, kind: input, shape index: {}]   ;;  %s135_s3 = inlined_call_operand.vmem [shape: bf16[16,32], index: 3, kind: output, shape index: {}]  }
   0x1   :  { %v86_v0 = vld [vmem:[%s132_s0] sm:$0xff]  }
   0x2   :  { %v87_v1 = vunpack.c.l.bf16 %v86_v0  ;;  %v88_v2 = vunpack.c.h.bf16 %v86_v0  ;;  %v79_v22 = vld [vmem:[%s133_s1] ss:$0 sm:$0xff] }
   0x3   :  { %v80_v24 = vld [vmem:[%s134_s2] ss:$0 sm:$0xff] }
   0x4   :  { %v21_v3 = vsel %vm20_vm0, %v87_v1, 0.0  ;;  %v24_v4 = vsel %vm20_vm0, %v88_v2, 0.0 }
   0x5   :  { %22 = vadd.xlane.f32.xlu0 %v21_v3 }
   0x9   :  { %25 = vadd.xlane.f32.xlu0 %v24_v4 }
  0x92   :  { %v23_v5 = vpop.xlane.xlu0 %22 }
  0x93   :  { %v28_v6 = vmul.f32 0.03125, %v23_v5 }
  0x95   :  { %v30_v7 = vsub.f32 %v87_v1, %v28_v6 }
  0x96   :  { %v26_v8 = vpop.xlane.xlu0 %25 }
  0x97   :  { %v29_v9 = vmul.f32 0.03125, %v26_v8  ;;  %v32_v10 = vmul.f32 %v30_v7, %v30_v7 }
  0x99   :  { %v31_v11 = vsub.f32 %v88_v2, %v29_v9  ;;  %v34_v12 = vsel %vm20_vm0, %v32_v10, 0.0 }
  0x9a   :  { %35 = vadd.xlane.f32.xlu1 %v34_v12 }
  0x9b   :  { %v33_v13 = vmul.f32 %v31_v11, %v31_v11 }
  0x9d   :  { %v37_v14 = vsel %vm20_vm0, %v33_v13, 0.0 }
  0x9e   :  { %38 = vadd.xlane.f32.xlu1 %v37_v14 }
 0x127   :  { %v36_v15 = vpop.xlane.xlu1 %35 }
 0x128   :  { %v40_v16 = vmul.f32 0.03125, %v36_v15 }
 0x12a   :  { %v42_v17 = vadd.f32 1e-12, %v40_v16 }
 0x12b   :  { %v39_v18 = vpop.xlane.xlu1 %38 }
 0x12c   :  { %89 = vrsqrt.f32 %v42_v17  ;;  %v41_v19 = vmul.f32 0.03125, %v39_v18 }
 0x12e   :  { %v43_v20 = vadd.f32 1e-12, %v41_v19 }
 0x130   :  { %91 = vrsqrt.f32 %v43_v20 }
 0x136   :  { %v90_v21 = vpop.eup %89 }
 0x137   :  { %v46_v23 = vmul.f32 %v90_v21, %v30_v7 }
 0x139   :  { %v54_v25 = vmul.f32 %v79_v22, %v46_v23 }
 0x13a   :  { %v92_v26 = vpop.eup %91 }
 0x13b   :  { %v62_v27 = vadd.f32 %v80_v24, %v54_v25  ;;  %v47_v28 = vmul.f32 %v92_v26, %v31_v11 }
 0x13d   :  { %v83_v29 = vpack.c.bf16 %v62_v27, %v62_v27  ;;  %v55_v30 = vmul.f32 %v79_v22, %v47_v28 }
 0x13f   :  { %73 = vst.msk [vmem:[%s135_s3] sm:$0xf] %vm72_vm1, %v83_v29  ;;  %v63_v31 = vadd.f32 %v80_v24, %v55_v30 }
 0x141   :  { %v84_v32 = vpack.c.bf16 %v63_v31, %v63_v31 }
 0x143   :  { %74 = vst.msk [vmem:[%s135_s3 + $0x4] sm:$0xf] %vm72_vm1, %v84_v32 }

// kernel: bert_mlp_classifier.14
= control target key start
LH: loop header
LB: loop body
LE: loop exit
PB: predicated region body
PF: predicated region fallthrough
CT: control target
= control target key end

     0   :  { %s871_s15 = smov 0   ;;  %s873_s16 = smov 0   ;;  %s933_s0 = inlined_call_operand.vmem [shape: bf16[2,2,8,16], index: 0, kind: input, shape index: {}]   ;;  %s934_s1 = inlined_call_operand.vmem [shape: bf16[2,2,8,16], index: 1, kind: input, shape index: {}]   ;;  %s935_s2 = inlined_call_operand.vmem [shape: bf16[2,2,8,16], index: 2, kind: input, shape index: {}]   ;;  %s936_s3 = inlined_call_operand.vmem [shape: f32[2,1,8], index: 3, kind: input, shape index: {}]   ;;  %s937_s4 = inlined_call_operand.vmem [shape: bf16[2,2,8,16], index: 4, kind: output, shape index: {}]  }
   0x1   :  { %s875_s17 = smov 0  }
   0x2 LB: > { %s33_s18 = sadd.s32 1, %s838_s16  ;;  %p734_p0 = scmp.ge.s32.totalorder %s842_s17, 1  ;;  %s842_s17 = sphi %s875_s17, %s14_s17   ;;  %s838_s16 = sphi %s873_s16, %s939_s16   ;;  %s834_s15 = sphi %s871_s15, %s938_s15  }
   0x3   : > { %p35_p1 = scmp.ge.s32.totalorder %s33_s18, 2  ;;  %p239_p2 = scmp.lt.s32.totalorder %s842_s17, 3 }
   0x5   : > { %s941_s18 = smov (%p35_p1, %s33_s18), 0  ;;  %p240_p3 = pnand %p734_p0, %p239_p2 }
   0x6   : > { %p301_p4 = scmp.lt.s32.totalorder (!%p240_p3), %s834_s15, 1  ;;  %v844_v0 = vmov (!%p240_p3), 0.0   ;;  %vm845_vm0 = vmmov (!%p240_p3), 0   ;;  %vm366_vm1 = vcmask (!%p240_p3), 130048   ;;  %vm459_vm2 = vcmask (!%p240_p3), 64512  }
   0x7   : > { %243 = sbr.rel (%p240_p3) target bundleno = 775 (0x307), region = 36  ;;  %762 = vmatprep.subr.bf16.mxu0 (!%p240_p3), %v844_v0  ;;  %768 = vmatprep.subr.bf16.mxu1 (!%p240_p3), %v844_v0  ;;  %vm487_vm3 = vcmask (!%p240_p3), 1043456   ;;  %vm579_vm4 = vcmask (!%p240_p3), 125952  }
   0x8   : > { %764 = vmatprep.mubr.msk.bf16.mxu0 (!%p240_p3), %vm845_vm0, %v844_v0  ;;  %770 = vmatprep.mubr.msk.bf16.mxu1 (!%p240_p3), %vm845_vm0, %v844_v0 }
   0xe   : > { %s943_s15 = smov (!%p301_p4, %s834_s15), 1 }
   0xf   : > { %s891_s19 = sshll.u32 %s943_s15, 3  ;;  %s335_s28 = scalar_lea.vmem %s936_s3, %s943_s15 }
  0x10   : > { %s321_s22 = scalar_lea.vmem %s934_s1, %s891_s19  ;;  %s311_s25 = scalar_lea.vmem %s933_s0, %s891_s19  ;;  %v743_v9 = vld [vmem:[%s335_s28] ss:$0 sm:$0xff] }
  0x11   : > { %v355_v1 = vld [vmem:[%s321_s22] sm:$0xf]  ;;  %v356_v2 = vld [vmem:[%s321_s22 + $0x4] sm:$0xf]  ;;  %s331_s5 = scalar_lea.vmem %s935_s2, %s891_s19  ;;  %s347_s8 = scalar_lea.vmem %s937_s4, %s891_s19 }
  0x12   : > { %v371_v3 = vsel %vm366_vm1, %v355_v1, 0  ;;  %v417_v4 = vsel %vm366_vm1, %v356_v2, 0  ;;  %v351_v5 = vld [vmem:[%s311_s25] sm:$0xf]  ;;  %v352_v6 = vld [vmem:[%s311_s25 + $0x4] sm:$0xf] }
  0x13   : > { %763 = vmatpush3.bf16.xpose.msra.mxu0 %v371_v3  ;;  %769 = vmatpush3.bf16.xpose.msra.mxu1 %v417_v4  ;;  %v353_v7 = vmul.bf16 1048592000, %v351_v5  ;;  %v354_v8 = vmul.bf16 1048592000, %v352_v6  ;;  %v357_v32 = vld [vmem:[%s331_s5] sm:$0xf] }
  0x14   : > { %774 = vmatprep.subr.bf16.mxu0 %v844_v0  ;;  %780 = vmatprep.subr.bf16.mxu1 %v844_v0  ;;  %v489_v33 = vsel %vm487_vm3, %v357_v32, 0  ;;  %v358_v34 = vld [vmem:[%s331_s5 + $0x4] sm:$0xf] }
  0x15   : > { %v535_v35 = vsel %vm487_vm3, %v358_v34, 0 }
  0x1a   : > { %765 = vmatmul.mubr.msk.bf16.vlgmr.msra.gmra.mrb[0].mxu0 %vm366_vm1, %v353_v7  ;;  %771 = vmatmul.mubr.msk.bf16.vlgmr.msra.gmra.mrb[0].mxu1 %vm366_vm1, %v354_v8 }
  0x1b   : > { %776 = vmatprep.mubr.msk.bf16.mxu0 %vm845_vm0, %v844_v0  ;;  %782 = vmatprep.mubr.msk.bf16.mxu1 %vm845_vm0, %v844_v0 }
  0x1c   : > { %775 = vmatpush3.bf16.msra.mxu0 %v489_v33  ;;  %781 = vmatpush3.bf16.msra.mxu1 %v535_v35 }
  0xed   : > { %v407_v10 = vpop.f32.mrb[0].mxu0  ;;  %v453_v11 = vpop.f32.mrb[0].mxu1 }
  0xee   : > { %v408_v12 = vadd.f32 %v743_v9, %v407_v10  ;;  %v766_v13 = vpop.f32.mrb[1].mxu0  ;;  %v454_v14 = vadd.f32 %v743_v9, %v453_v11  ;;  %v772_v15 = vpop.f32.mrb[1].mxu1 }
  0xef   : > { %v410_v16 = vpop.f32.mrb[2].mxu0  ;;  %v456_v17 = vpop.f32.mrb[2].mxu1 }
  0xf0   : > { %v767_v18 = vpop.f32.mrb[3].mxu0  ;;  %v773_v19 = vpop.f32.mrb[3].mxu1  ;;  %v460_v20 = vsel %vm459_vm2, %v408_v12, -inf  ;;  %v463_v21 = vsel %vm459_vm2, %v454_v14, -inf }
  0xf1   : > { %461 = vmax.xlane.f32.xlu0 %v460_v20 }
  0xf5   : > { %464 = vmax.xlane.f32.xlu0 %v463_v21 }
 0x17e   : > { %v462_v22 = vpop.xlane.xlu0 %461 }
 0x17f   : > { %v466_v23 = vsub.f32 %v408_v12, %v462_v22 }
 0x181   : > { %v468_v24 = vmul.f32 1.442695, %v466_v23 }
 0x182   : > { %v465_v25 = vpop.xlane.xlu0 %464 }
 0x183   : > { %812 = vpow2.f32 %v468_v24  ;;  %v467_v26 = vsub.f32 %v454_v14, %v465_v25 }
 0x185   : > { %v470_v27 = vmul.f32 1.442695, %v467_v26 }
 0x187   : > { %814 = vpow2.f32 %v470_v27 }
 0x18d   : > { %v813_v28 = vpop.eup %812 }
 0x18e   : > { %v472_v29 = vsel %vm459_vm2, %v813_v28, 0.0 }
 0x18f   : > { %473 = vadd.xlane.f32.xlu1 %v472_v29 }
 0x191   : > { %v815_v30 = vpop.eup %814 }
 0x192   : > { %v475_v31 = vsel %vm459_vm2, %v815_v30, 0.0 }
 0x193   : > { %476 = vadd.xlane.f32.xlu1 %v475_v31 }
 0x21c   : > { %v474_v36 = vpop.xlane.xlu1 %473 }
 0x21d   : > { %816 = vrcp.f32 %v474_v36 }
 0x220   : > { %v477_v37 = vpop.xlane.xlu1 %476 }
 0x221   : > { %818 = vrcp.f32 %v477_v37 }
 0x227   : > { %v817_v38 = vpop.eup %816 }
 0x228   : > { %v480_v39 = vmul.f32 %v817_v38, %v813_v28 }
 0x22a   : > { %v482_v40 = vpack.c.bf16 %v480_v39, %v480_v39 }
 0x22b   : > { %v819_v41 = vpop.eup %818 }
 0x22c   : > { %v481_v42 = vmul.f32 %v819_v41, %v815_v30  ;;  %777 = vmatmul.mubr.msk.bf16.vlgmr.msra.gmra.mrb[4].mxu0 %vm459_vm2, %v482_v40 }
 0x22e   : > { %v483_v43 = vpack.c.bf16 %v481_v42, %v481_v42 }
 0x230   : > { %783 = vmatmul.mubr.msk.bf16.vlgmr.msra.gmra.mrb[4].mxu1 %vm459_vm2, %v483_v43 }
 0x2ff   : > { %v525_v44 = vpop.f32.mrb[4].mxu0 }
 0x300   : > { %v577_v45 = vpack.c.bf16 %v525_v44, %v525_v44  ;;  %v778_v46 = vpop.f32.mrb[5].mxu0 }
 0x301   : > { %v528_v47 = vpop.f32.mrb[6].mxu0 }
 0x302   : > { %580 = vst.msk [vmem:[%s347_s8] sm:$0xf] %vm579_vm4, %v577_v45  ;;  %v779_v48 = vpop.f32.mrb[7].mxu0 }
 0x303   : > { %v571_v49 = vpop.f32.mrb[4].mxu1 }
 0x304   : > { %v578_v50 = vpack.c.bf16 %v571_v49, %v571_v49  ;;  %v784_v51 = vpop.f32.mrb[5].mxu1 }
 0x305   : > { %v574_v52 = vpop.f32.mrb[6].mxu1 }
 0x306   : > { %581 = vst.msk [vmem:[%s347_s8 + $0x4] sm:$0xf] %vm579_vm4, %v578_v50  ;;  %v785_v53 = vpop.f32.mrb[7].mxu1 }
 0x307 PF: > { %s14_s17 = sadd.s32 1, %s842_s17   ;;  %s938_s15 = smov %s838_s16 }
 0x308   : > { %p11_p5 = scmp.ge.s32.totalorder %s14_s17, 4   ;;  %s939_s16 = smov %s941_s18 }
 0x30a   :  { %13 = sbr.rel (!%p11_p5) target bundleno = 2 (0x2), region = 75 }

// kernel: bert_mlp_classifier.15
= control target key start
LH: loop header
LB: loop body
LE: loop exit
PB: predicated region body
PF: predicated region fallthrough
CT: control target
= control target key end

     0   :  { %v200_v0 = vmov 0.0   ;;  %vm201_vm0 = vmmov 0   ;;  %vm54_vm1 = vcmask 261120   ;;  %vm158_vm2 = vcmask 257024   ;;  %s269_s1 = inlined_call_operand.vmem [shape: bf16[32,32], index: 1, kind: input, shape index: {}]   ;;  %s270_s0 = inlined_call_operand.vmem [shape: bf16[16,32], index: 0, kind: input, shape index: {}]   ;;  %s271_s3 = inlined_call_operand.vmem [shape: bf16[16,32], index: 3, kind: input, shape index: {}]   ;;  %s272_s2 = inlined_call_operand.vmem [shape: f32[1,32], index: 2, kind: input, shape index: {}]   ;;  %s273_s4 = inlined_call_operand.vmem [shape: f32[1,32], index: 4, kind: input, shape index: {}]   ;;  %s274_s5 = inlined_call_operand.vmem [shape: f32[1,32], index: 5, kind: input, shape index: {}]   ;;  %s275_s6 = inlined_call_operand.vmem [shape: bf16[16,32], index: 6, kind: output, shape index: {}]  }
   0x1   :  { %183 = vmatprep.subr.bf16.mxu0 %v200_v0  ;;  %v193_v1 = vld [vmem:[%s269_s1] sm:$0xff]   ;;  %187 = vmatprep.mubr.msk.bf16.mxu0 %vm201_vm0, %v200_v0  ;;  %v194_v2 = vld [vmem:[%s269_s1 + $0x8] sm:$0xff]  }
   0x2   :  { %184 = vmatpush3.bf16.msra.mxu0 %v193_v1  ;;  %v195_v3 = vld [vmem:[%s270_s0] sm:$0xff]  }
   0x3   :  { %185 = vmatprep.subr.bf16.mxu0 %v200_v0  ;;  %v177_v4 = vld [vmem:[%s271_s3] sm:$0xff]  }
   0x4   :  { %v165_v5 = vld [vmem:[%s272_s2] ss:$0 sm:$0xff]  ;;  %v178_v6 = vunpack.c.l.bf16 %v177_v4  ;;  %v179_v10 = vunpack.c.h.bf16 %v177_v4 }
   0x5   :  { %v170_v35 = vld [vmem:[%s273_s4] ss:$0 sm:$0xff] }
   0x6   :  { %186 = vmatpush3.bf16.msra.mxu0 %v194_v2  ;;  %v171_v37 = vld [vmem:[%s274_s5] ss:$0 sm:$0xff] }
   0x9   :  { %188 = vmatmul.mubr.msk.bf16.vlgmr.msra.gmra.mrb[0].mxu0 %vm54_vm1, %v195_v3 }
  0xdc   :  { %v92_v7 = vpop.f32.mrb[0].mxu0 }
  0xdd   :  { %v93_v8 = vadd.f32 %v165_v5, %v92_v7  ;;  %v189_v9 = vpop.f32.mrb[1].mxu0 }
  0xde   :  { %v95_v11 = vpop.f32.mrb[2].mxu0 }
  0xdf   :  { %v96_v12 = vadd.f32 %v165_v5, %v95_v11  ;;  %v190_v13 = vpop.f32.mrb[3].mxu0  ;;  %v103_v14 = vadd.f32 %v178_v6, %v93_v8 }
  0xe1   :  { %v107_v15 = vsel %vm54_vm1, %v103_v14, 0.0  ;;  %v104_v16 = vadd.f32 %v179_v10, %v96_v12 }
  0xe2   :  { %108 = vadd.xlane.f32.xlu0 %v107_v15 }
  0xe3   :  { %v110_v17 = vsel %vm54_vm1, %v104_v16, 0.0 }
  0xe6   :  { %111 = vadd.xlane.f32.xlu0 %v110_v17 }
 0x16f   :  { %v109_v18 = vpop.xlane.xlu0 %108 }
 0x170   :  { %v114_v19 = vmul.f32 0.03125, %v109_v18 }
 0x172   :  { %v116_v20 = vsub.f32 %v103_v14, %v114_v19 }
 0x173   :  { %v112_v21 = vpop.xlane.xlu0 %111 }
 0x174   :  { %v115_v22 = vmul.f32 0.03125, %v112_v21  ;;  %v118_v23 = vmul.f32 %v116_v20, %v116_v20 }
 0x176   :  { %v117_v24 = vsub.f32 %v104_v16, %v115_v22  ;;  %v120_v25 = vsel %vm54_vm1, %v118_v23, 0.0 }
 0x177   :  { %121 = vadd.xlane.f32.xlu1 %v120_v25 }
 0x178   :  { %v119_v26 = vmul.f32 %v117_v24, %v117_v24 }
 0x17a   :  { %v123_v27 = vsel %vm54_vm1, %v119_v26, 0.0 }
 0x17b   :  { %124 = vadd.xlane.f32.xlu1 %v123_v27 }
 0x204   :  { %v122_v28 = vpop.xlane.xlu1 %121 }
 0x205   :  { %v126_v29 = vmul.f32 0.03125, %v122_v28 }
 0x207   :  { %v128_v30 = vadd.f32 1e-12, %v126_v29 }
 0x208   :  { %v125_v31 = vpop.xlane.xlu1 %124 }
 0x209   :  { %196 = vrsqrt.f32 %v128_v30  ;;  %v127_v32 = vmul.f32 0.03125, %v125_v31 }
 0x20b   :  { %v129_v33 = vadd.f32 1e-12, %v127_v32 }
 0x20d   :  { %198 = vrsqrt.f32 %v129_v33 }
 0x213   :  { %v197_v34 = vpop.eup %196 }
 0x214   :  { %v132_v36 = vmul.f32 %v197_v34, %v116_v20 }
 0x216   :  { %v140_v38 = vmul.f32 %v170_v35, %v132_v36 }
 0x217   :  { %v199_v39 = vpop.eup %198 }
 0x218   :  { %v148_v40 = vadd.f32 %v171_v37, %v140_v38  ;;  %v133_v41 = vmul.f32 %v199_v39, %v117_v24 }
 0x21a   :  { %v174_v42 = vpack.c.bf16 %v148_v40, %v148_v40  ;;  %v141_v43 = vmul.f32 %v170_v35, %v133_v41 }
 0x21c   :  { %159 = vst.msk [vmem:[%s275_s6] sm:$0xf] %vm158_vm2, %v174_v42  ;;  %v149_v44 = vadd.f32 %v171_v37, %v141_v43 }
 0x21e   :  { %v175_v45 = vpack.c.bf16 %v149_v44, %v149_v44 }
 0x220   :  { %160 = vst.msk [vmem:[%s275_s6 + $0x4] sm:$0xf] %vm158_vm2, %v175_v45 }

// kernel: bert_mlp_classifier.17
= control target key start
LH: loop header
LB: loop body
LE: loop exit
PB: predicated region body
PF: predicated region fallthrough
CT: control target
= control target key end

     0   :  { %v227_v0 = vmov 0.0   ;;  %vm228_vm0 = vmmov 0   ;;  %vm70_vm1 = vcmask 523264   ;;  %vm123_vm2 = vcmask 261120   ;;  %s301_s1 = inlined_call_operand.vmem [shape: bf16[64,32], index: 1, kind: input, shape index: {}]   ;;  %s302_s0 = inlined_call_operand.vmem [shape: bf16[16,64], index: 0, kind: input, shape index: {}]   ;;  %s303_s3 = inlined_call_operand.vmem [shape: bf16[16,32], index: 3, kind: input, shape index: {}]   ;;  %s304_s2 = inlined_call_operand.vmem [shape: f32[1,32], index: 2, kind: input, shape index: {}]   ;;  %s305_s4 = inlined_call_operand.vmem [shape: f32[1,32], index: 4, kind: input, shape index: {}]   ;;  %s306_s5 = inlined_call_operand.vmem [shape: f32[1,32], index: 5, kind: input, shape index: {}]   ;;  %s307_s6 = inlined_call_operand.vmem [shape: bf16[16,32], index: 6, kind: output, shape index: {}]  }
   0x1   :  { %204 = vmatprep.subr.bf16.mxu0 %v227_v0  ;;  %v218_v1 = vld [vmem:[%s301_s1] sm:$0xff]   ;;  %212 = vmatprep.mubr.msk.bf16.mxu0 %vm228_vm0, %v227_v0  ;;  %v219_v2 = vld [vmem:[%s301_s1 + $0x8] sm:$0xff]   ;;  %v220_v3 = vld [vmem:[%s301_s1 + $0x10] sm:$0xff]   ;;  %vm175_vm3 = vcmask 257024  }
   0x2   :  { %205 = vmatpush3.bf16.msra.mxu0 %v218_v1  ;;  %v221_v4 = vld [vmem:[%s301_s1 + $0x18] sm:$0xff]   ;;  %v222_v5 = vld [vmem:[%s302_s0] sm:$0xff]  }
   0x3   :  { %206 = vmatprep.subr.bf16.mxu0 %v227_v0  ;;  %v196_v6 = vld [vmem:[%s303_s3] sm:$0xff]  }
   0x4   :  { %v182_v7 = vld [vmem:[%s304_s2] ss:$0 sm:$0xff]  ;;  %v197_v8 = vunpack.c.l.bf16 %v196_v6  ;;  %v198_v12 = vunpack.c.h.bf16 %v196_v6 }
   0x5   :  { %v189_v37 = vld [vmem:[%s305_s4] ss:$0 sm:$0xff] }
   0x6   :  { %207 = vmatpush3.bf16.msra.mxu0 %v219_v2  ;;  %v190_v39 = vld [vmem:[%s306_s5] ss:$0 sm:$0xff] }
   0x7   :  { %208 = vmatprep.subr.bf16.mxu0 %v227_v0 }
   0xa   :  { %209 = vmatpush3.bf16.msra.mxu0 %v220_v3 }
   0xb   :  { %210 = vmatprep.subr.bf16.mxu0 %v227_v0 }
   0xe   :  { %211 = vmatpush3.bf16.msra.mxu0 %v221_v4 }
  0x11   :  { %213 = vmatmul.mubr.msk.bf16.vlgmr.msra.gmra.mrb[0].mxu0 %vm70_vm1, %v222_v5 }
  0xe4   :  { %v108_v9 = vpop.f32.mrb[0].mxu0 }
  0xe5   :  { %v109_v10 = vadd.f32 %v182_v7, %v108_v9  ;;  %v214_v11 = vpop.f32.mrb[1].mxu0 }
  0xe6   :  { %v111_v13 = vpop.f32.mrb[2].mxu0 }
  0xe7   :  { %v112_v14 = vadd.f32 %v182_v7, %v111_v13  ;;  %v215_v15 = vpop.f32.mrb[3].mxu0  ;;  %v119_v16 = vadd.f32 %v197_v8, %v109_v10 }
  0xe9   :  { %v124_v17 = vsel %vm123_vm2, %v119_v16, 0.0  ;;  %v120_v18 = vadd.f32 %v198_v12, %v112_v14 }
  0xea   :  { %125 = vadd.xlane.f32.xlu0 %v124_v17 }
  0xeb   :  { %v127_v19 = vsel %vm123_vm2, %v120_v18, 0.0 }
  0xee   :  { %128 = vadd.xlane.f32.xlu0 %v127_v19 }
 0x177   :  { %v126_v20 = vpop.xlane.xlu0 %125 }
 0x178   :  { %v131_v21 = vmul.f32 0.03125, %v126_v20 }
 0x17a   :  { %v133_v22 = vsub.f32 %v119_v16, %v131_v21 }
 0x17b   :  { %v129_v23 = vpop.xlane.xlu0 %128 }
 0x17c   :  { %v132_v24 = vmul.f32 0.03125, %v129_v23  ;;  %v135_v25 = vmul.f32 %v133_v22, %v133_v22 }
 0x17e   :  { %v134_v26 = vsub.f32 %v120_v18, %v132_v24  ;;  %v137_v27 = vsel %vm123_vm2, %v135_v25, 0.0 }
 0x17f   :  { %138 = vadd.xlane.f32.xlu1 %v137_v27 }
 0x180   :  { %v136_v28 = vmul.f32 %v134_v26, %v134_v26 }
 0x182   :  { %v140_v29 = vsel %vm123_vm2, %v136_v28, 0.0 }
 0x183   :  { %141 = vadd.xlane.f32.xlu1 %v140_v29 }
 0x20c   :  { %v139_v30 = vpop.xlane.xlu1 %138 }
 0x20d   :  { %v143_v31 = vmul.f32 0.03125, %v139_v30 }
 0x20f   :  { %v145_v32 = vadd.f32 1e-12, %v143_v31 }
 0x210   :  { %v142_v33 = vpop.xlane.xlu1 %141 }
 0x211   :  { %223 = vrsqrt.f32 %v145_v32  ;;  %v144_v34 = vmul.f32 0.03125, %v142_v33 }
 0x213   :  { %v146_v35 = vadd.f32 1e-12, %v144_v34 }
 0x215   :  { %225 = vrsqrt.f32 %v146_v35 }
 0x21b   :  { %v224_v36 = vpop.eup %223 }
 0x21c   :  { %v149_v38 = vmul.f32 %v224_v36, %v133_v22 }
 0x21e   :  { %v157_v40 = vmul.f32 %v189_v37, %v149_v38 }
 0x21f   :  { %v226_v41 = vpop.eup %225 }
 0x220   :  { %v165_v42 = vadd.f32 %v190_v39, %v157_v40  ;;  %v150_v43 = vmul.f32 %v226_v41, %v134_v26 }
 0x222   :  { %v193_v44 = vpack.c.bf16 %v165_v42, %v165_v42  ;;  %v158_v45 = vmul.f32 %v189_v37, %v150_v43 }
 0x224   :  { %176 = vst.msk [vmem:[%s307_s6] sm:$0xf] %vm175_vm3, %v193_v44  ;;  %v166_v46 = vadd.f32 %v190_v39, %v158_v45 }
 0x226   :  { %v194_v47 = vpack.c.bf16 %v166_v46, %v166_v46 }
 0x228   :  { %177 = vst.msk [vmem:[%s307_s6 + $0x4] sm:$0xf] %vm175_vm3, %v194_v47 }

// kernel: bert_mlp_classifier.16
= control target key start
LH: loop header
LB: loop body
LE: loop exit
PB: predicated region body
PF: predicated region fallthrough
CT: control target
= control target key end

     0   :  { %v152_v0 = vmov 0.0   ;;  %vm153_vm0 = vmmov 0   ;;  %vm45_vm1 = vcmask 261120   ;;  %vm116_vm2 = vcmask 519168   ;;  %s192_s1 = inlined_call_operand.vmem [shape: bf16[32,64], index: 1, kind: input, shape index: {}]   ;;  %s193_s0 = inlined_call_operand.vmem [shape: bf16[16,32], index: 0, kind: input, shape index: {}]   ;;  %s194_s2 = inlined_call_operand.vmem [shape: f32[1,64], index: 2, kind: input, shape index: {}]   ;;  %s195_s3 = inlined_call_operand.vmem [shape: bf16[16,64], index: 3, kind: output, shape index: {}]  }
   0x1   :  { %135 = vmatprep.subr.bf16.mxu0 %v152_v0  ;;  %v145_v1 = vld [vmem:[%s192_s1] sm:$0xff]   ;;  %139 = vmatprep.mubr.msk.bf16.mxu0 %vm153_vm0, %v152_v0  ;;  %v146_v2 = vld [vmem:[%s192_s1 + $0x8] sm:$0xff]  }
   0x2   :  { %136 = vmatpush3.bf16.msra.mxu0 %v145_v1  ;;  %v147_v3 = vld [vmem:[%s193_s0] sm:$0xff]  }
   0x3   :  { %137 = vmatprep.subr.bf16.mxu0 %v152_v0  ;;  %v123_v4 = vld [vmem:[%s194_s2] ss:$0 sm:$0xff] }
   0x6   :  { %138 = vmatpush3.bf16.msra.mxu0 %v146_v2 }
   0x9   :  { %140 = vmatmul.mubr.msk.bf16.vlgmr.msra.gmra.mrb[0].mxu0 %vm45_vm1, %v147_v3 }
  0xdc   :  { %v83_v5 = vpop.f32.mrb[0].mxu0 }
  0xdd   :  { %v84_v6 = vadd.f32 %v123_v4, %v83_v5  ;;  %v141_v7 = vpop.f32.mrb[1].mxu0 }
  0xde   :  { %v86_v8 = vpop.f32.mrb[2].mxu0 }
  0xdf   :  { %v90_v9 = vmul.f32 %v84_v6, %v84_v6  ;;  %v87_v10 = vadd.f32 %v123_v4, %v86_v8  ;;  %v142_v11 = vpop.f32.mrb[3].mxu0 }
  0xe1   :  { %v92_v12 = vmul.f32 %v90_v9, %v84_v6  ;;  %v91_v13 = vmul.f32 %v87_v10, %v87_v10 }
  0xe3   :  { %v94_v14 = vmul.f32 0.044715, %v92_v12  ;;  %v93_v15 = vmul.f32 %v91_v13, %v87_v10 }
  0xe5   :  { %v96_v16 = vadd.f32 %v94_v14, %v84_v6  ;;  %v95_v17 = vmul.f32 0.044715, %v93_v15 }
  0xe7   :  { %v98_v18 = vmul.f32 0.7978846, %v96_v16  ;;  %v97_v19 = vadd.f32 %v95_v17, %v87_v10 }
  0xe9   :  { %148 = vtanh.f32 %v98_v18  ;;  %v99_v20 = vmul.f32 0.7978846, %v97_v19 }
  0xeb   :  { %150 = vtanh.f32 %v99_v20 }
  0xf3   :  { %v149_v21 = vpop.eup %148 }
  0xf4   :  { %v102_v22 = vadd.f32 1.0, %v149_v21 }
  0xf5   :  { %v151_v23 = vpop.eup %150 }
  0xf6   :  { %v104_v24 = vmul.f32 0.5, %v102_v22  ;;  %v103_v25 = vadd.f32 1.0, %v151_v23 }
  0xf8   :  { %v106_v26 = vmul.f32 %v104_v24, %v84_v6  ;;  %v105_v27 = vmul.f32 0.5, %v103_v25 }
  0xfa   :  { %v130_v28 = vpack.c.bf16 %v106_v26, %v106_v26  ;;  %v107_v29 = vmul.f32 %v105_v27, %v87_v10 }
  0xfc   :  { %117 = vst.msk [vmem:[%s195_s3] sm:$0xf] %vm116_vm2, %v130_v28  ;;  %v131_v30 = vpack.c.bf16 %v107_v29, %v107_v29 }
  0xfe   :  { %118 = vst.msk [vmem:[%s195_s3 + $0x4] sm:$0xf] %vm116_vm2, %v131_v30 }

// kernel: bert_mlp_classifier.23
= control target key start
LH: loop header
LB: loop body
LE: loop exit
PB: predicated region body
PF: predicated region fallthrough
CT: control target
= control target key end

     0   :  { %v200_v0 = vmov 0.0   ;;  %vm201_vm0 = vmmov 0   ;;  %vm47_vm1 = vcmask 261120   ;;  %vm108_vm2 = vcmask 130048   ;;  %s253_s1 = inlined_call_operand.vmem [shape: bf16[32,16], index: 1, kind: input, shape index: {}]   ;;  %s254_s0 = inlined_call_operand.vmem [shape: bf16[2,32], index: 0, kind: input, shape index: {}]   ;;  %s255_s3 = inlined_call_operand.vmem [shape: bf16[16,1], index: 3, kind: input, shape index: {}]   ;;  %s256_s4 = inlined_call_operand.<no memory space> [shape: f32[1,1], index: 4, kind: input, shape index: {}]   ;;  %s257_s2 = inlined_call_operand.vmem [shape: f32[1,16], index: 2, kind: input, shape index: {}]   ;;  %s258_s5 = inlined_call_operand.vmem [shape: f32[2,1], index: 5, kind: output, shape index: {}]  }
   0x1   :  { %177 = vmatprep.subr.bf16.mxu0 %v200_v0  ;;  %v193_v1 = vld [vmem:[%s253_s1] sm:$0xff]   ;;  %181 = vmatprep.mubr.msk.bf16.mxu0 %vm201_vm0, %v200_v0  ;;  %v194_v2 = vld [vmem:[%s253_s1 + $0x8] sm:$0xff]   ;;  %v10_v5 = vstv %s256_s4  ;;  %vm158_vm3 = vcmask 1024  }
   0x2   :  { %185 = vmatprep.subr.bf16.mxu1 %v200_v0  ;;  %187 = vmatprep.mubr.msk.bf16.mxu1 %vm201_vm0, %v200_v0  ;;  %v23_v3 = vld [vmem:[%s254_s0] sm:$0x1]  ;;  %11 = vst [vmem:[#allocation2] sm:$0x1] %v10_v5 }
   0x3   :  { %178 = vmatpush3.bf16.msra.mxu0 %v193_v1  ;;  %v195_v4 = vld [vmem:[%s255_s3] sm:$0xff]  }
   0x4   :  { %179 = vmatprep.subr.bf16.mxu0 %v200_v0  ;;  %186 = vmatpush3.bf16.msra.mxu1 %v195_v4  ;;  %v164_v6 = vld [vmem:[%s257_s2] ss:$0 sm:$0xff] }
   0x7   :  { %180 = vmatpush3.bf16.msra.mxu0 %v194_v2 }
   0x9   :  { %v168_v14 = vld [vmem:[#allocation2] ss:$0 sm:$0xff] }
   0xa   :  { %182 = vmatmul.mubr.msk.bf16.vlgmr.msra.gmra.mrb[0].mxu0 %vm47_vm1, %v23_v3 }
  0xdd   :  { %v85_v7 = vpop.f32.mrb[0].mxu0 }
  0xde   :  { %v86_v8 = vadd.f32 %v164_v6, %v85_v7  ;;  %v183_v9 = vpop.f32.mrb[1].mxu0 }
  0xdf   :  { %v88_v10 = vpop.f32.mrb[2].mxu0 }
  0xe0   :  { %v91_v11 = vmax.f32 %v86_v8, 0.0  ;;  %v184_v12 = vpop.f32.mrb[3].mxu0 }
  0xe2   :  { %v92_v13 = vpack.c.bf16 %v91_v11, %v91_v11 }
  0xe4   :  { %188 = vmatmul.mubr.msk.bf16.vlgmr.msra.gmra.mrb[0].mxu1 %vm108_vm2, %v92_v13 }
 0x1b7   :  { %v146_v15 = vpop.f32.mrb[0].mxu1 }
 0x1b8   :  { %v147_v16 = vadd.f32 %v168_v14, %v146_v15  ;;  %v189_v17 = vpop.f32.mrb[1].mxu1 }
 0x1b9   :  { %v149_v18 = vpop.f32.mrb[2].mxu1 }
 0x1ba   :  { %v171_v19 = vmul.f32 -1.442695, %v147_v16  ;;  %v190_v20 = vpop.f32.mrb[3].mxu1 }
 0x1bc   :  { %196 = vpow2.f32 %v171_v19 }
 0x1c6   :  { %v197_v21 = vpop.eup %196 }
 0x1c7   :  { %v155_v22 = vadd.f32 1.0, %v197_v21 }
 0x1c9   :  { %198 = vrcp.f32 %v155_v22 }
 0x1d3   :  { %v199_v23 = vpop.eup %198 }
 0x1d4   :  { %159 = vst.msk [vmem:[%s258_s5] sm:$0x3] %vm158_vm3, %v199_v23 }

</bundles_post_ra>
